<compile_context>
chip_gen: v7x
topology: tpu7x:2x2x1
jax: 0.10.0
libtpu: 0.0.40
codegen_flags: <defaults>
</compile_context>

<pallas_src>
import jax
import jax.numpy as jnp
from jax import lax
from jax.experimental import pallas as pl
from jax.experimental.pallas import tpu as pltpu


HIDDEN = 256  # intermediate channels of every head's ConvBlock
HEAD_OUT_CHANNELS = [1, 2, 2, 17, 2, 34]  # hm, wh, reg, pose_hm, pose_offset, pose_kps
NUM_HEADS = len(HEAD_OUT_CHANNELS)


def _round_up(x, m):
    return ((x + m - 1) // m) * m


# Per-head output channels padded to the f32 sublane granularity (8) and packed
# back-to-back on one flat channel axis: [8, 8, 8, 24, 8, 40] -> 96 channels.
HEAD_PAD = [_round_up(c, 8) for c in HEAD_OUT_CHANNELS]
HEAD_OFFSET = [sum(HEAD_PAD[:i]) for i in range(NUM_HEADS)]
C_PACK = sum(HEAD_PAD)  # 96


def _pick_tile(hw_pad, k_pad, vmem_budget=20 * 1024 * 1024):
    """Largest lane tile (multiple of 128, preferring multiples of 256) that
    divides the padded spatial dim and keeps the per-step VMEM estimate under
    budget (sized for v7x's 64 MiB/TC VMEM)."""
    for t in (2048, 1024, 512, 256, 128):
        if hw_pad % t:
            continue
        est = (2 * k_pad * t * 2                      # xc tile, double-buffered, bf16
               + 2 * C_PACK * t * 4                   # out tile, double-buffered, f32
               + 2 * NUM_HEADS * HIDDEN * k_pad * 2   # resident w1 (worst-case 2 bufs)
               + 2 * C_PACK * HIDDEN * 2              # resident w2
               + C_PACK * 128 * 4                     # resident b2 (lane-padded)
               + HIDDEN * t * 6)                      # hid temporaries (f32 + bf16)
        if est <= vmem_budget:
            return t
    return 128


def _fused_heads_kernel(xc_ref, w1_ref, w2_ref, b2_ref, out_ref):
    """One (batch elem, spatial tile) grid step; all 6 heads unrolled.

    xc_ref : (1, K_pad, TILE_N)          bf16  im2col tile (lanes = spatial);
                                               row K is the constant 1.0 used
                                               to fold b1 into the 3x3 matmul.
    w1_ref : (NUM_HEADS, HIDDEN, K_pad)  bf16  resident (constant index_map)
    w2_ref : (C_PACK, HIDDEN)            bf16  resident, packed channel rows
    b2_ref : (C_PACK, 1)                 f32   resident
    out_ref: (1, C_PACK, TILE_N)         f32   packed lane-dense output tile
    """
    xc = xc_ref[0]  # loaded once, reused by all 6 heads
    for h in range(NUM_HEADS):
        off = HEAD_OFFSET[h]
        cpad = HEAD_PAD[h]
        # 3x3 conv as one wide-K MXU matmul, f32 accumulation (b1 folded in).
        hid = jnp.dot(w1_ref[h], xc, preferred_element_type=jnp.float32)
        # ReLU on the VPU, cast back to bf16 for the second MXU matmul.
        hid = jnp.maximum(hid, 0.0).astype(w2_ref.dtype)
        # 1x1 conv (second MXU matmul) + bias, stored into this head's packed
        # 8-aligned channel slice -> full-lane unmasked stores.
        out = jnp.dot(w2_ref[off:off + cpad, :], hid,
                      preferred_element_type=jnp.float32)
        out_ref[0, off:off + cpad, :] = out + b2_ref[off:off + cpad, :]


def _im2col_nchw(x_nchw):
    """(B, C, H, W) -> (B, 9*C, H*W); tap order (dy, dx, cin) matches HWIO w1."""
    b, c, h, w = x_nchw.shape
    xp = jnp.pad(x_nchw, ((0, 0), (0, 0), (1, 1), (1, 1)))
    taps = [xp[:, :, dy:dy + h, dx:dx + w] for dy in range(3) for dx in range(3)]
    col = jnp.stack(taps, axis=1)            # (B, 9, C, H, W)
    return col.reshape(b, 9 * c, h * w)      # (B, 9*C, H*W)


def init_center_head_params(key, intermediate_channel):
    """Deterministic synthetic weights for the 6 heads (shapes from __init__)."""
    params = []
    for idx, cout in enumerate(HEAD_OUT_CHANNELS):
        k1, k2, k3, k4 = jax.random.split(jax.random.fold_in(key, idx), 4)
        w1 = jax.random.normal(k1, (3, 3, intermediate_channel, HIDDEN),
                               jnp.float32) * 0.05
        b1 = jax.random.normal(k2, (1, HIDDEN), jnp.float32) * 0.05
        w2 = jax.random.normal(k3, (HIDDEN, cout), jnp.float32) * 0.05
        b2 = jax.random.normal(k4, (1, cout), jnp.float32) * 0.05
        params.append((w1, b1, w2, b2))
    return params


def pack_head_params(params):
    """Pack per-head weights into kernel-resident layouts.

    Returns:
      w1t: (NUM_HEADS, HIDDEN, K_pad) bf16, column K holds b1 (folded bias).
      w2p: (C_PACK, HIDDEN)           bf16, per-head rows at packed offsets.
      b2p: (C_PACK, 1)                f32.
    """
    cin = params[0][0].shape[2]
    k = 9 * cin
    # +1 column for the folded b1; round to 16 for clean bf16 sublane packing.
    k_pad = _round_up(k + 1, 16)
    w1t = jnp.zeros((NUM_HEADS, HIDDEN, k_pad), jnp.float32)
    w2p = jnp.zeros((C_PACK, HIDDEN), jnp.float32)
    b2p = jnp.zeros((C_PACK, 1), jnp.float32)
    for h, (w1, b1, w2, b2) in enumerate(params):
        w1m = w1.reshape(k, HIDDEN).T                       # (HIDDEN, 9*Cin)
        w1t = w1t.at[h, :, :k].set(w1m)
        w1t = w1t.at[h, :, k].set(b1.reshape(HIDDEN))       # folded b1
        off = HEAD_OFFSET[h]
        cout = w2.shape[1]
        w2p = w2p.at[off:off + cout, :].set(w2.T)           # (cout, HIDDEN)
        b2p = b2p.at[off:off + cout, 0].set(b2.reshape(cout))
    return w1t.astype(jnp.bfloat16), w2p.astype(jnp.bfloat16), b2p


@jax.jit
def centernet_forward(x_nchw, packed):
    """CenterNet forward.  x_nchw: (B, C, H, W) backbone feature map (backbone
    itself is a TODO stub).  Returns the list of 6 head outputs in NCHW."""
    w1t, w2p, b2p = packed
    B, C, H, W = x_nchw.shape
    hw = H * W
    k = 9 * C
    k_pad = w1t.shape[-1]

    hw_pad = _round_up(hw, 128)
    tile_n = _pick_tile(hw_pad, k_pad)
    n_sp = hw_pad // tile_n

    # im2col in the wrapper: lanes = spatial, contraction = 9*Cin, then one row
    # of ones (folded b1) and zero rows up to K_pad.
    x_col = _im2col_nchw(x_nchw)
    x_col = jnp.pad(x_col, ((0, 0), (0, 0), (0, hw_pad - hw)))
    ones = jnp.ones((B, 1, hw_pad), x_col.dtype)
    zeros = jnp.zeros((B, k_pad - k - 1, hw_pad), x_col.dtype)
    x_col = jnp.concatenate([x_col, ones, zeros], axis=1).astype(jnp.bfloat16)

    # Weights are read once (resident constant-index blocks), not per step.
    flops = 2 * B * hw_pad * (NUM_HEADS * HIDDEN * k_pad + C_PACK * HIDDEN)
    bytes_accessed = (x_col.size * 2
                      + w1t.size * 2 + w2p.size * 2 + b2p.size * 4
                      + B * C_PACK * hw_pad * 4)

    out = pl.pallas_call(
        _fused_heads_kernel,
        out_shape=jax.ShapeDtypeStruct((B, C_PACK, hw_pad), jnp.float32),
        grid_spec=pltpu.PrefetchScalarGridSpec(
            num_scalar_prefetch=0,
            grid=(B, n_sp),
            in_specs=[
                pl.BlockSpec((1, k_pad, tile_n), lambda b, n: (b, 0, n)),
                # Constant index_maps: weights DMA'd once, stay VMEM-resident.
                pl.BlockSpec((NUM_HEADS, HIDDEN, k_pad), lambda b, n: (0, 0, 0)),
                pl.BlockSpec((C_PACK, HIDDEN), lambda b, n: (0, 0)),
                pl.BlockSpec((C_PACK, 1), lambda b, n: (0, 0)),
            ],
            out_specs=pl.BlockSpec((1, C_PACK, tile_n), lambda b, n: (b, 0, n)),
        ),
        compiler_params=pltpu.CompilerParams(
            # Megacore split stays on batch/spatial (no head axis to shard).
            dimension_semantics=("parallel", "parallel"),
            vmem_limit_bytes=32 * 1024 * 1024,
        ),
        cost_estimate=pl.CostEstimate(
            flops=flops, transcendentals=0, bytes_accessed=bytes_accessed,
        ),
    )(x_col, w1t, w2p, b2p)

    # Packed output is already NCHW-ordered (channels on sublanes, spatial on
    # lanes): slice each head's real channels + real spatial extent, reshape.
    outs = []
    for h, c in enumerate(HEAD_OUT_CHANNELS):
        off = HEAD_OFFSET[h]
        outs.append(out[:, off:off + c, :hw].reshape(B, c, H, W))
    return outs


def _reference_head(x_nchw, w1, b1, w2, b2):
    """Plain-JAX f32 reference (NCHW convs) for verification."""
    y = lax.conv_general_dilated(
        x_nchw, jnp.transpose(w1, (3, 2, 0, 1)),  # HWIO -> OIHW
        window_strides=(1, 1), padding=((1, 1), (1, 1)),
        dimension_numbers=("NCHW", "OIHW", "NCHW"),
    ) + b1.reshape(1, HIDDEN, 1, 1)
    y = jnp.maximum(y, 0.0)
    y = lax.conv_general_dilated(
        y, jnp.transpose(w2, (1, 0)).reshape(w2.shape[1], HIDDEN, 1, 1),
        window_strides=(1, 1), padding=((0, 0), (0, 0)),
        dimension_numbers=("NCHW", "OIHW", "NCHW"),
    ) + b2.reshape(1, -1, 1, 1)
    return y


if __name__ == "__main__":
    key = jax.random.PRNGKey(0)
    k_x, k_p = jax.random.split(key)

    # Small synthetic shapes: batch=2, intermediate_channel=4, feature map 16x16
    # (i.e. an input image of 64x64 with down_ratio=4).
    B, C, H, W = 2, 4, 16, 16
    x = jax.random.normal(k_x, (B, C, H, W), jnp.float32)

    params = init_center_head_params(k_p, C)
    packed = pack_head_params(params)

    outs = centernet_forward(x, packed)
    outs = [jax.block_until_ready(o) for o in outs]

    # Sanity check shapes and values against the plain-JAX f32 reference.
    expected_shapes = [(B, c, H, W) for c in HEAD_OUT_CHANNELS]
    assert [tuple(o.shape) for o in outs] == expected_shapes, \
        f"shape mismatch: {[o.shape for o in outs]}"

    # Tolerance loosened vs. the pure-f32 reference because matmul operands
    # (and the folded b1) are bf16 with f32 accumulation on the MXU.
    for o, (w1, b1, w2, b2) in zip(outs, params):
        ref = _reference_head(x, w1, b1, w2, b2)
        max_diff = jnp.max(jnp.abs(o - ref))
        assert jnp.allclose(o, ref, atol=2e-2, rtol=2e-2), \
            f"numerical mismatch: max abs diff {max_diff}"

    print("KERNEL_OK")
</pallas_src>

<mosaic_0001>
module attributes {stable_mosaic.version = 11 : i64} {
  func.func @_fused_heads_kernel(%arg0: i32, %arg1: i32, %arg2: memref<1x48x256xbf16, #tpu.memory_space<vmem>>, %arg3: memref<6x256x48xbf16, #tpu.memory_space<vmem>>, %arg4: memref<96x256xbf16, #tpu.memory_space<vmem>>, %arg5: memref<96x1xf32, #tpu.memory_space<vmem>>, %arg6: memref<1x96x256xf32, #tpu.memory_space<vmem>>) attributes {dimension_semantics = [#tpu.dimension_semantics<parallel>, #tpu.dimension_semantics<parallel>], iteration_bounds = array<i64: 2, 1>, scalar_prefetch = 0 : i64, scratch_operands = 0 : i64, tpu.core_type = #tpu.core_type<tc>, window_params = [{transform_indices = @transform_0, window_bounds = array<i64: 1, 48, 256>}, {pipeline_mode = #tpu.pipeline_mode<synchronous>, transform_indices = @transform_1, window_bounds = array<i64: 6, 256, 48>}, {pipeline_mode = #tpu.pipeline_mode<synchronous>, transform_indices = @transform_2, window_bounds = array<i64: 96, 256>}, {pipeline_mode = #tpu.pipeline_mode<synchronous>, transform_indices = @transform_3, window_bounds = array<i64: 96, 1>}, {transform_indices = @transform_4, window_bounds = array<i64: 1, 96, 256>}]} {
    %c0 = arith.constant 0 : index
    %c0_0 = arith.constant 0 : index
    %c0_1 = arith.constant 0 : index
    %0 = vector.load %arg2[%c0, %c0_0, %c0_1] : memref<1x48x256xbf16, #tpu.memory_space<vmem>>, vector<1x48x256xbf16>
    %1 = vector.shape_cast %0 : vector<1x48x256xbf16> to vector<48x256xbf16>
    %c0_2 = arith.constant 0 : index
    %c0_3 = arith.constant 0 : index
    %c0_4 = arith.constant 0 : index
    %2 = vector.load %arg3[%c0_2, %c0_3, %c0_4] : memref<6x256x48xbf16, #tpu.memory_space<vmem>>, vector<1x256x48xbf16>
    %3 = vector.shape_cast %2 : vector<1x256x48xbf16> to vector<256x48xbf16>
    %cst = arith.constant dense<0.000000e+00> : vector<256x256xf32>
    %4 = tpu.matmul %3, %1, %cst {dimension_numbers = #tpu.dot_dimension_numbers<[1], [0], [0], [1], [0, 0, 1, 1], [], []>} : vector<256x48xbf16>, vector<48x256xbf16>, vector<256x256xf32> -> vector<256x256xf32>
    %cst_5 = arith.constant 0.000000e+00 : f32
    %5 = vector.broadcast %cst_5 : f32 to vector<256x256xf32>
    %6 = arith.maximumf %4, %5 : vector<256x256xf32>
    %7 = arith.truncf %6 : vector<256x256xf32> to vector<256x256xbf16>
    %c0_6 = arith.constant 0 : index
    %c0_7 = arith.constant 0 : index
    %8 = vector.load %arg4[%c0_6, %c0_7] : memref<96x256xbf16, #tpu.memory_space<vmem>>, vector<8x256xbf16>
    %cst_8 = arith.constant dense<0.000000e+00> : vector<8x256xf32>
    %9 = tpu.matmul %8, %7, %cst_8 {dimension_numbers = #tpu.dot_dimension_numbers<[1], [0], [0], [1], [0, 0, 1, 1], [], []>} : vector<8x256xbf16>, vector<256x256xbf16>, vector<8x256xf32> -> vector<8x256xf32>
    %c0_9 = arith.constant 0 : index
    %c0_10 = arith.constant 0 : index
    %10 = vector.load %arg5[%c0_9, %c0_10] : memref<96x1xf32, #tpu.memory_space<vmem>>, vector<8x1xf32>
    %11 = vector.broadcast %10 : vector<8x1xf32> to vector<8x256xf32>
    %12 = arith.addf %9, %11 : vector<8x256xf32>
    %c0_11 = arith.constant 0 : index
    %c0_12 = arith.constant 0 : index
    %c0_13 = arith.constant 0 : index
    %13 = vector.load %arg6[%c0_11, %c0_12, %c0_13] : memref<1x96x256xf32, #tpu.memory_space<vmem>>, vector<1x8x256xf32>
    %14 = vector.shape_cast %13 : vector<1x8x256xf32> to vector<8x256xf32>
    %15 = vector.shape_cast %12 : vector<8x256xf32> to vector<1x8x256xf32>
    tpu.vector_store %arg6[%c0_11, %c0_12, %c0_13], %15 {strides = array<i32>} : memref<1x96x256xf32, #tpu.memory_space<vmem>>, vector<1x8x256xf32>,
    %c1 = arith.constant 1 : index
    %c0_14 = arith.constant 0 : index
    %c0_15 = arith.constant 0 : index
    %16 = vector.load %arg3[%c1, %c0_14, %c0_15] : memref<6x256x48xbf16, #tpu.memory_space<vmem>>, vector<1x256x48xbf16>
    %17 = vector.shape_cast %16 : vector<1x256x48xbf16> to vector<256x48xbf16>
    %cst_16 = arith.constant dense<0.000000e+00> : vector<256x256xf32>
    %18 = tpu.matmul %17, %1, %cst_16 {dimension_numbers = #tpu.dot_dimension_numbers<[1], [0], [0], [1], [0, 0, 1, 1], [], []>} : vector<256x48xbf16>, vector<48x256xbf16>, vector<256x256xf32> -> vector<256x256xf32>
    %cst_17 = arith.constant 0.000000e+00 : f32
    %19 = vector.broadcast %cst_17 : f32 to vector<256x256xf32>
    %20 = arith.maximumf %18, %19 : vector<256x256xf32>
    %21 = arith.truncf %20 : vector<256x256xf32> to vector<256x256xbf16>
    %c8 = arith.constant 8 : index
    %c0_18 = arith.constant 0 : index
    %22 = vector.load %arg4[%c8, %c0_18] : memref<96x256xbf16, #tpu.memory_space<vmem>>, vector<8x256xbf16>
    %cst_19 = arith.constant dense<0.000000e+00> : vector<8x256xf32>
    %23 = tpu.matmul %22, %21, %cst_19 {dimension_numbers = #tpu.dot_dimension_numbers<[1], [0], [0], [1], [0, 0, 1, 1], [], []>} : vector<8x256xbf16>, vector<256x256xbf16>, vector<8x256xf32> -> vector<8x256xf32>
    %c8_20 = arith.constant 8 : index
    %c0_21 = arith.constant 0 : index
    %24 = vector.load %arg5[%c8_20, %c0_21] : memref<96x1xf32, #tpu.memory_space<vmem>>, vector<8x1xf32>
    %25 = vector.broadcast %24 : vector<8x1xf32> to vector<8x256xf32>
    %26 = arith.addf %23, %25 : vector<8x256xf32>
    %c0_22 = arith.constant 0 : index
    %c8_23 = arith.constant 8 : index
    %c0_24 = arith.constant 0 : index
    %27 = vector.load %arg6[%c0_22, %c8_23, %c0_24] : memref<1x96x256xf32, #tpu.memory_space<vmem>>, vector<1x8x256xf32>
    %28 = vector.shape_cast %27 : vector<1x8x256xf32> to vector<8x256xf32>
    %29 = vector.shape_cast %26 : vector<8x256xf32> to vector<1x8x256xf32>
    tpu.vector_store %arg6[%c0_22, %c8_23, %c0_24], %29 {strides = array<i32>} : memref<1x96x256xf32, #tpu.memory_space<vmem>>, vector<1x8x256xf32>,
    %c2 = arith.constant 2 : index
    %c0_25 = arith.constant 0 : index
    %c0_26 = arith.constant 0 : index
    %30 = vector.load %arg3[%c2, %c0_25, %c0_26] : memref<6x256x48xbf16, #tpu.memory_space<vmem>>, vector<1x256x48xbf16>
    %31 = vector.shape_cast %30 : vector<1x256x48xbf16> to vector<256x48xbf16>
    %cst_27 = arith.constant dense<0.000000e+00> : vector<256x256xf32>
    %32 = tpu.matmul %31, %1, %cst_27 {dimension_numbers = #tpu.dot_dimension_numbers<[1], [0], [0], [1], [0, 0, 1, 1], [], []>} : vector<256x48xbf16>, vector<48x256xbf16>, vector<256x256xf32> -> vector<256x256xf32>
    %cst_28 = arith.constant 0.000000e+00 : f32
    %33 = vector.broadcast %cst_28 : f32 to vector<256x256xf32>
    %34 = arith.maximumf %32, %33 : vector<256x256xf32>
    %35 = arith.truncf %34 : vector<256x256xf32> to vector<256x256xbf16>
    %c16 = arith.constant 16 : index
    %c0_29 = arith.constant 0 : index
    %36 = vector.load %arg4[%c16, %c0_29] : memref<96x256xbf16, #tpu.memory_space<vmem>>, vector<8x256xbf16>
    %cst_30 = arith.constant dense<0.000000e+00> : vector<8x256xf32>
    %37 = tpu.matmul %36, %35, %cst_30 {dimension_numbers = #tpu.dot_dimension_numbers<[1], [0], [0], [1], [0, 0, 1, 1], [], []>} : vector<8x256xbf16>, vector<256x256xbf16>, vector<8x256xf32> -> vector<8x256xf32>
    %c16_31 = arith.constant 16 : index
    %c0_32 = arith.constant 0 : index
    %38 = vector.load %arg5[%c16_31, %c0_32] : memref<96x1xf32, #tpu.memory_space<vmem>>, vector<8x1xf32>
    %39 = vector.broadcast %38 : vector<8x1xf32> to vector<8x256xf32>
    %40 = arith.addf %37, %39 : vector<8x256xf32>
    %c0_33 = arith.constant 0 : index
    %c16_34 = arith.constant 16 : index
    %c0_35 = arith.constant 0 : index
    %41 = vector.load %arg6[%c0_33, %c16_34, %c0_35] : memref<1x96x256xf32, #tpu.memory_space<vmem>>, vector<1x8x256xf32>
    %42 = vector.shape_cast %41 : vector<1x8x256xf32> to vector<8x256xf32>
    %43 = vector.shape_cast %40 : vector<8x256xf32> to vector<1x8x256xf32>
    tpu.vector_store %arg6[%c0_33, %c16_34, %c0_35], %43 {strides = array<i32>} : memref<1x96x256xf32, #tpu.memory_space<vmem>>, vector<1x8x256xf32>,
    %c3 = arith.constant 3 : index
    %c0_36 = arith.constant 0 : index
    %c0_37 = arith.constant 0 : index
    %44 = vector.load %arg3[%c3, %c0_36, %c0_37] : memref<6x256x48xbf16, #tpu.memory_space<vmem>>, vector<1x256x48xbf16>
    %45 = vector.shape_cast %44 : vector<1x256x48xbf16> to vector<256x48xbf16>
    %cst_38 = arith.constant dense<0.000000e+00> : vector<256x256xf32>
    %46 = tpu.matmul %45, %1, %cst_38 {dimension_numbers = #tpu.dot_dimension_numbers<[1], [0], [0], [1], [0, 0, 1, 1], [], []>} : vector<256x48xbf16>, vector<48x256xbf16>, vector<256x256xf32> -> vector<256x256xf32>
    %cst_39 = arith.constant 0.000000e+00 : f32
    %47 = vector.broadcast %cst_39 : f32 to vector<256x256xf32>
    %48 = arith.maximumf %46, %47 : vector<256x256xf32>
    %49 = arith.truncf %48 : vector<256x256xf32> to vector<256x256xbf16>
    %c24 = arith.constant 24 : index
    %c0_40 = arith.constant 0 : index
    %50 = vector.load %arg4[%c24, %c0_40] : memref<96x256xbf16, #tpu.memory_space<vmem>>, vector<24x256xbf16>
    %cst_41 = arith.constant dense<0.000000e+00> : vector<24x256xf32>
    %51 = tpu.matmul %50, %49, %cst_41 {dimension_numbers = #tpu.dot_dimension_numbers<[1], [0], [0], [1], [0, 0, 1, 1], [], []>} : vector<24x256xbf16>, vector<256x256xbf16>, vector<24x256xf32> -> vector<24x256xf32>
    %c24_42 = arith.constant 24 : index
    %c0_43 = arith.constant 0 : index
    %52 = vector.load %arg5[%c24_42, %c0_43] : memref<96x1xf32, #tpu.memory_space<vmem>>, vector<24x1xf32>
    %53 = vector.broadcast %52 : vector<24x1xf32> to vector<24x256xf32>
    %54 = arith.addf %51, %53 : vector<24x256xf32>
    %c0_44 = arith.constant 0 : index
    %c24_45 = arith.constant 24 : index
    %c0_46 = arith.constant 0 : index
    %55 = vector.load %arg6[%c0_44, %c24_45, %c0_46] : memref<1x96x256xf32, #tpu.memory_space<vmem>>, vector<1x24x256xf32>
    %56 = vector.shape_cast %55 : vector<1x24x256xf32> to vector<24x256xf32>
    %57 = vector.shape_cast %54 : vector<24x256xf32> to vector<1x24x256xf32>
    tpu.vector_store %arg6[%c0_44, %c24_45, %c0_46], %57 {strides = array<i32>} : memref<1x96x256xf32, #tpu.memory_space<vmem>>, vector<1x24x256xf32>,
    %c4 = arith.constant 4 : index
    %c0_47 = arith.constant 0 : index
    %c0_48 = arith.constant 0 : index
    %58 = vector.load %arg3[%c4, %c0_47, %c0_48] : memref<6x256x48xbf16, #tpu.memory_space<vmem>>, vector<1x256x48xbf16>
    %59 = vector.shape_cast %58 : vector<1x256x48xbf16> to vector<256x48xbf16>
    %cst_49 = arith.constant dense<0.000000e+00> : vector<256x256xf32>
    %60 = tpu.matmul %59, %1, %cst_49 {dimension_numbers = #tpu.dot_dimension_numbers<[1], [0], [0], [1], [0, 0, 1, 1], [], []>} : vector<256x48xbf16>, vector<48x256xbf16>, vector<256x256xf32> -> vector<256x256xf32>
    %cst_50 = arith.constant 0.000000e+00 : f32
    %61 = vector.broadcast %cst_50 : f32 to vector<256x256xf32>
    %62 = arith.maximumf %60, %61 : vector<256x256xf32>
    %63 = arith.truncf %62 : vector<256x256xf32> to vector<256x256xbf16>
    %c48 = arith.constant 48 : index
    %c0_51 = arith.constant 0 : index
    %64 = vector.load %arg4[%c48, %c0_51] : memref<96x256xbf16, #tpu.memory_space<vmem>>, vector<8x256xbf16>
    %cst_52 = arith.constant dense<0.000000e+00> : vector<8x256xf32>
    %65 = tpu.matmul %64, %63, %cst_52 {dimension_numbers = #tpu.dot_dimension_numbers<[1], [0], [0], [1], [0, 0, 1, 1], [], []>} : vector<8x256xbf16>, vector<256x256xbf16>, vector<8x256xf32> -> vector<8x256xf32>
    %c48_53 = arith.constant 48 : index
    %c0_54 = arith.constant 0 : index
    %66 = vector.load %arg5[%c48_53, %c0_54] : memref<96x1xf32, #tpu.memory_space<vmem>>, vector<8x1xf32>
    %67 = vector.broadcast %66 : vector<8x1xf32> to vector<8x256xf32>
    %68 = arith.addf %65, %67 : vector<8x256xf32>
    %c0_55 = arith.constant 0 : index
    %c48_56 = arith.constant 48 : index
    %c0_57 = arith.constant 0 : index
    %69 = vector.load %arg6[%c0_55, %c48_56, %c0_57] : memref<1x96x256xf32, #tpu.memory_space<vmem>>, vector<1x8x256xf32>
    %70 = vector.shape_cast %69 : vector<1x8x256xf32> to vector<8x256xf32>
    %71 = vector.shape_cast %68 : vector<8x256xf32> to vector<1x8x256xf32>
    tpu.vector_store %arg6[%c0_55, %c48_56, %c0_57], %71 {strides = array<i32>} : memref<1x96x256xf32, #tpu.memory_space<vmem>>, vector<1x8x256xf32>,
    %c5 = arith.constant 5 : index
    %c0_58 = arith.constant 0 : index
    %c0_59 = arith.constant 0 : index
    %72 = vector.load %arg3[%c5, %c0_58, %c0_59] : memref<6x256x48xbf16, #tpu.memory_space<vmem>>, vector<1x256x48xbf16>
    %73 = vector.shape_cast %72 : vector<1x256x48xbf16> to vector<256x48xbf16>
    %cst_60 = arith.constant dense<0.000000e+00> : vector<256x256xf32>
    %74 = tpu.matmul %73, %1, %cst_60 {dimension_numbers = #tpu.dot_dimension_numbers<[1], [0], [0], [1], [0, 0, 1, 1], [], []>} : vector<256x48xbf16>, vector<48x256xbf16>, vector<256x256xf32> -> vector<256x256xf32>
    %cst_61 = arith.constant 0.000000e+00 : f32
    %75 = vector.broadcast %cst_61 : f32 to vector<256x256xf32>
    %76 = arith.maximumf %74, %75 : vector<256x256xf32>
    %77 = arith.truncf %76 : vector<256x256xf32> to vector<256x256xbf16>
    %c56 = arith.constant 56 : index
    %c0_62 = arith.constant 0 : index
    %78 = vector.load %arg4[%c56, %c0_62] : memref<96x256xbf16, #tpu.memory_space<vmem>>, vector<40x256xbf16>
    %cst_63 = arith.constant dense<0.000000e+00> : vector<40x256xf32>
    %79 = tpu.matmul %78, %77, %cst_63 {dimension_numbers = #tpu.dot_dimension_numbers<[1], [0], [0], [1], [0, 0, 1, 1], [], []>} : vector<40x256xbf16>, vector<256x256xbf16>, vector<40x256xf32> -> vector<40x256xf32>
    %c56_64 = arith.constant 56 : index
    %c0_65 = arith.constant 0 : index
    %80 = vector.load %arg5[%c56_64, %c0_65] : memref<96x1xf32, #tpu.memory_space<vmem>>, vector<40x1xf32>
    %81 = vector.broadcast %80 : vector<40x1xf32> to vector<40x256xf32>
    %82 = arith.addf %79, %81 : vector<40x256xf32>
    %c0_66 = arith.constant 0 : index
    %c56_67 = arith.constant 56 : index
    %c0_68 = arith.constant 0 : index
    %83 = vector.load %arg6[%c0_66, %c56_67, %c0_68] : memref<1x96x256xf32, #tpu.memory_space<vmem>>, vector<1x40x256xf32>
    %84 = vector.shape_cast %83 : vector<1x40x256xf32> to vector<40x256xf32>
    %85 = vector.shape_cast %82 : vector<40x256xf32> to vector<1x40x256xf32>
    tpu.vector_store %arg6[%c0_66, %c56_67, %c0_68], %85 {strides = array<i32>} : memref<1x96x256xf32, #tpu.memory_space<vmem>>, vector<1x40x256xf32>,
    return
  }
  func.func @transform_0(%arg0: i32, %arg1: i32) -> (i32, i32, i32) {
    %c0_i32 = arith.constant 0 : i32
    %c0_i32_0 = arith.constant 0 : i32
    return %arg0, %c0_i32, %arg1 : i32, i32, i32
  }
  func.func @transform_1(%arg0: i32, %arg1: i32) -> (i32, i32, i32) {
    %c0_i32 = arith.constant 0 : i32
    %c0_i32_0 = arith.constant 0 : i32
    %c0_i32_1 = arith.constant 0 : i32
    %c0_i32_2 = arith.constant 0 : i32
    return %c0_i32, %c0_i32_0, %c0_i32_1 : i32, i32, i32
  }
  func.func @transform_2(%arg0: i32, %arg1: i32) -> (i32, i32) {
    %c0_i32 = arith.constant 0 : i32
    %c0_i32_0 = arith.constant 0 : i32
    %c0_i32_1 = arith.constant 0 : i32
    return %c0_i32, %c0_i32_0 : i32, i32
  }
  func.func @transform_3(%arg0: i32, %arg1: i32) -> (i32, i32) {
    %c0_i32 = arith.constant 0 : i32
    %c0_i32_0 = arith.constant 0 : i32
    %c0_i32_1 = arith.constant 0 : i32
    return %c0_i32, %c0_i32_0 : i32, i32
  }
  func.func @transform_4(%arg0: i32, %arg1: i32) -> (i32, i32, i32) {
    %c0_i32 = arith.constant 0 : i32
    %c0_i32_0 = arith.constant 0 : i32
    return %arg0, %c0_i32, %arg1 : i32, i32, i32
  }
}

</mosaic_0001>

<bundles_post_ra>
// kernel: centernet_forward.1
= control target key start
LH: loop header
LB: loop body
LE: loop exit
PB: predicated region body
PF: predicated region fallthrough
CT: control target
= control target key end

     0   :  { %s4119_s15 = smov 0   ;;  %s4121_s16 = smov 0   ;;  %s4852_s0 = inlined_call_operand.vmem [shape: bf16[2,48,256], index: 0, kind: input, shape index: {}]   ;;  %s4853_s1 = inlined_call_operand.vmem [shape: bf16[6,256,48], index: 1, kind: input, shape index: {}]   ;;  %s4854_s2 = inlined_call_operand.vmem [shape: bf16[96,256], index: 2, kind: input, shape index: {}]   ;;  %s4855_s3 = inlined_call_operand.vmem [shape: f32[96,1], index: 3, kind: input, shape index: {}]   ;;  %s4856_s4 = inlined_call_operand.vmem [shape: f32[2,96,256], index: 4, kind: output, shape index: {}]  }
   0x1   :  { %s4123_s17 = smov 0  }
   0x2 LB: > { %s26_s18 = sadd.s32 1, %s4087_s16  ;;  %p3521_p0 = scmp.ge.s32.totalorder %s4091_s17, 1  ;;  %s4091_s17 = sphi %s4123_s17, %s14_s17   ;;  %s4087_s16 = sphi %s4121_s16, %s4858_s16   ;;  %s4083_s15 = sphi %s4119_s15, %s4857_s15  }
   0x3   : > { %p28_p1 = scmp.ge.s32.totalorder %s26_s18, 2  ;;  %p183_p2 = scmp.lt.s32.totalorder %s4091_s17, 3 }
   0x5   : > { %s4860_s18 = smov (%p28_p1, %s26_s18), 0  ;;  %p184_p3 = pnand %p3521_p0, %p183_p2 }
   0x6   : > { %p218_p4 = scmp.lt.s32.totalorder (!%p184_p3), %s4083_s15, 1  ;;  %v4093_v0 = vmov (!%p184_p3), 0   ;;  %v3940_v7 = vld [vmem:[%s4853_s1] sm:$0xff] (!%p184_p3)   ;;  %vm386_vm0 = vcmask (!%p184_p3), 392192   ;;  %v3941_v8 = vld [vmem:[%s4853_s1 + $0x8] sm:$0xff] (!%p184_p3)   ;;  %v3942_v9 = vld [vmem:[%s4853_s1 + $0x10] sm:$0xff] (!%p184_p3)  }
   0x7   : > { %187 = sbr.rel (%p184_p3) target bundleno = 2385 (0x951), region = 36  ;;  %467 = vmatprep.mubr.bf16.mxu0 (!%p184_p3), %v4093_v0  ;;  %3929 = vset.pattern.permute.xlu0 (!%p184_p3), %v4093_v0  ;;  %v3943_v10 = vld [vmem:[%s4853_s1 + $0x18] sm:$0xff] (!%p184_p3)   ;;  %v3944_v11 = vld [vmem:[%s4853_s1 + $0x20] sm:$0xff] (!%p184_p3)   ;;  %v3945_v12 = vld [vmem:[%s4853_s1 + $0x28] sm:$0xff] (!%p184_p3)  }
   0x8   : > { %3930 = vset.pattern.permute.xlu1 (!%p184_p3), %v4093_v0  ;;  %v3946_v13 = vld [vmem:[%s4853_s1 + $0x30] sm:$0xff] (!%p184_p3)   ;;  %v3947_v14 = vld [vmem:[%s4853_s1 + $0x38] sm:$0xff] (!%p184_p3)   ;;  %v3948_v15 = vld [vmem:[%s4853_s1 + $0x40] sm:$0xff] (!%p184_p3)  }
   0x9   : > { %v3949_v16 = vld [vmem:[%s4853_s1 + $0x48] sm:$0xff] (!%p184_p3)   ;;  %v3950_v17 = vld [vmem:[%s4853_s1 + $0x50] sm:$0xff] (!%p184_p3)   ;;  %v3951_v18 = vld [vmem:[%s4853_s1 + $0x58] sm:$0xff] (!%p184_p3)  }
   0xa   : > { %v3952_v19 = vld [vmem:[%s4853_s1 + $0x60] sm:$0xff] (!%p184_p3)   ;;  %v3953_v20 = vld [vmem:[%s4853_s1 + $0x68] sm:$0xff] (!%p184_p3)   ;;  %v3954_v21 = vld [vmem:[%s4853_s1 + $0x70] sm:$0xff] (!%p184_p3)  }
   0xb   : > { %v3955_v22 = vld [vmem:[%s4853_s1 + $0x78] sm:$0xff] (!%p184_p3)   ;;  %v4254_v24 = vld [vmem:[%s4854_s2] sm:$0xff] (!%p184_p3) }
   0xc   : > { %v3563_v26 = vcombine.high (!%p184_p3), %v4254_v24, %v4254_v24 }
   0xe   : > { %s4862_s15 = smov (!%p218_p4, %s4083_s15), 1  ;;  %770 = vmatprep.mubr.bf16.mxu1 %v3563_v26 }
   0xf   : > { %s3902_s19 = smul.u32 48, %s4862_s15 }
  0x10   : > { %s3903_s28 = smul.u32 192, %s4862_s15 }
  0x11   : > { %s4146_s22 = scalar_lea.vmem %s4852_s0, %s3902_s19 }
  0x12   : > { %v4149_v1 = vld [vmem:[%s4146_s22 + $0x4] ss:$8 sps:$4 sm:$0xff]   ;;  %v4152_v2 = vld [vmem:[%s4146_s22] ss:$8 sps:$4 sm:$0xff]   ;;  %v4156_v3 = vld [vmem:[%s4146_s22 + $0x14] ss:$8 sps:$4 sm:$0xff]   ;;  %s4353_s5 = scalar_lea.vmem %s4856_s4, %s3903_s28 }
  0x13   : > { %435 = vmatprep.subr.bf16.mxu0 %v4149_v1  ;;  %v4160_v4 = vld [vmem:[%s4146_s22 + $0x10] ss:$8 sps:$4 sm:$0xff]   ;;  %v4164_v5 = vld [vmem:[%s4146_s22 + $0x24] ss:$8 sps:$4 sm:$0xff]   ;;  %v4168_v6 = vld [vmem:[%s4146_s22 + $0x20] ss:$8 sps:$4 sm:$0xff]  }
  0x14   : > { %436 = vmatpush1.bf16.msra.mxu0 %v4152_v2 }
  0x15   : > { %437 = vmatprep.subr.bf16.mxu0 %v4156_v3 }
  0x18   : > { %438 = vmatpush1.bf16.msra.mxu0 %v4160_v4 }
  0x19   : > { %439 = vmatprep.subr.bf16.mxu0 %v4164_v5 }
  0x1c   : > { %440 = vmatpush1.bf16.msra.mxu0 %v4168_v6 }
  0x1f   : > { %3546 = vmatmul.mubr.msk.bf16.vlgmr.msra.gmra.mrb[0].mxu0 %vm386_vm0, %v3940_v7 }
  0x20   : > { %477 = vmatprep.mubr.bf16.mxu0 %v4093_v0 }
  0x27   : > { %3547 = vmatmul.mubr.msk.bf16.gmra.mrb[4].mxu0 %vm386_vm0, %v3941_v8 }
  0x28   : > { %487 = vmatprep.mubr.bf16.mxu0 %v4093_v0 }
  0x2f   : > { %3548 = vmatmul.mubr.msk.bf16.gmra.mrb[8].mxu0 %vm386_vm0, %v3942_v9 }
  0x30   : > { %497 = vmatprep.mubr.bf16.mxu0 %v4093_v0 }
  0x37   : > { %3549 = vmatmul.mubr.msk.bf16.gmra.mrb[12].mxu0 %vm386_vm0, %v3943_v10 }
  0x38   : > { %507 = vmatprep.mubr.bf16.mxu0 %v4093_v0 }
  0x3f   : > { %3550 = vmatmul.mubr.msk.bf16.gmra.mrb[16].mxu0 %vm386_vm0, %v3944_v11 }
  0x40   : > { %517 = vmatprep.mubr.bf16.mxu0 %v4093_v0 }
  0x47   : > { %3551 = vmatmul.mubr.msk.bf16.gmra.mrb[20].mxu0 %vm386_vm0, %v3945_v12 }
  0x48   : > { %527 = vmatprep.mubr.bf16.mxu0 %v4093_v0 }
  0x4f   : > { %3552 = vmatmul.mubr.msk.bf16.gmra.mrb[24].mxu0 %vm386_vm0, %v3946_v13 }
  0x50   : > { %537 = vmatprep.mubr.bf16.mxu0 %v4093_v0 }
  0x57   : > { %3553 = vmatmul.mubr.msk.bf16.gmra.mrb[28].mxu0 %vm386_vm0, %v3947_v14 }
  0x58   : > { %547 = vmatprep.mubr.bf16.mxu0 %v4093_v0 }
  0x5f   : > { %3554 = vmatmul.mubr.msk.bf16.gmra.mrb[32].mxu0 %vm386_vm0, %v3948_v15 }
  0x60   : > { %557 = vmatprep.mubr.bf16.mxu0 %v4093_v0 }
  0x67   : > { %3555 = vmatmul.mubr.msk.bf16.gmra.mrb[36].mxu0 %vm386_vm0, %v3949_v16 }
  0x68   : > { %567 = vmatprep.mubr.bf16.mxu0 %v4093_v0 }
  0x6f   : > { %3556 = vmatmul.mubr.msk.bf16.gmra.mrb[40].mxu0 %vm386_vm0, %v3950_v17 }
  0x70   : > { %577 = vmatprep.mubr.bf16.mxu0 %v4093_v0 }
  0x77   : > { %3557 = vmatmul.mubr.msk.bf16.gmra.mrb[44].mxu0 %vm386_vm0, %v3951_v18 }
  0x78   : > { %587 = vmatprep.mubr.bf16.mxu0 %v4093_v0 }
  0x7f   : > { %3558 = vmatmul.mubr.msk.bf16.gmra.mrb[48].mxu0 %vm386_vm0, %v3952_v19 }
  0x80   : > { %597 = vmatprep.mubr.bf16.mxu0 %v4093_v0 }
  0x87   : > { %3559 = vmatmul.mubr.msk.bf16.gmra.mrb[52].mxu0 %vm386_vm0, %v3953_v20 }
  0x88   : > { %607 = vmatprep.mubr.bf16.mxu0 %v4093_v0 }
  0x8f   : > { %3560 = vmatmul.mubr.msk.bf16.gmra.mrb[56].mxu0 %vm386_vm0, %v3954_v21 }
  0x90   : > { %617 = vmatprep.mubr.bf16.mxu0 %v4093_v0 }
  0x97   : > { %3561 = vmatmul.mubr.msk.bf16.gmra.mrb[60].mxu0 %vm386_vm0, %v3955_v22 }
  0xf2   : > { %v469_v23 = vpop.f32.mrb[0].mxu0 }
  0xf3   : > { %v471_v25 = vpop.f32.mrb[1].mxu0  ;;  %v628_v28 = vmax.f32 %v469_v23, 0.0 }
  0xf4   : > { %v473_v27 = vpop.f32.mrb[2].mxu0  ;;  %v629_v31 = vmax.f32 %v471_v25, 0.0 }
  0xf5   : > { %v630_v29 = vmax.f32 %v473_v27, 0.0  ;;  %v475_v30 = vpop.f32.mrb[3].mxu0 }
  0xf6   : > { %v631_v32 = vmax.f32 %v475_v30, 0.0 }
  0xf7   : > { %v692_v33 = vpack.c.bf16 %v630_v29, %v628_v28 }
  0xf8   : > { %v693_v34 = vpack.c.bf16 %v631_v32, %v629_v31 }
  0xfa   : > { %v479_v35 = vpop.f32.mrb[4].mxu0  ;;  %738 = vmatprep.subr.bf16.mxu1 %v693_v34 }
  0xfb   : > { %v481_v36 = vpop.f32.mrb[5].mxu0  ;;  %739 = vmatpush1.bf16.msra.mxu1 %v692_v33  ;;  %v632_v38 = vmax.f32 %v479_v35, 0.0 }
  0xfc   : > { %v483_v37 = vpop.f32.mrb[6].mxu0  ;;  %v633_v41 = vmax.f32 %v481_v36, 0.0 }
  0xfd   : > { %v634_v39 = vmax.f32 %v483_v37, 0.0  ;;  %v485_v40 = vpop.f32.mrb[7].mxu0 }
  0xfe   : > { %v635_v42 = vmax.f32 %v485_v40, 0.0 }
  0xff   : > { %v694_v43 = vpack.c.bf16 %v634_v39, %v632_v38 }
 0x100   : > { %v695_v44 = vpack.c.bf16 %v635_v42, %v633_v41 }
 0x102   : > { %v489_v45 = vpop.f32.mrb[8].mxu0  ;;  %740 = vmatprep.subr.bf16.mxu1 %v695_v44 }
 0x103   : > { %v491_v46 = vpop.f32.mrb[9].mxu0  ;;  %741 = vmatpush1.bf16.msra.mxu1 %v694_v43  ;;  %v636_v48 = vmax.f32 %v489_v45, 0.0 }
 0x104   : > { %v493_v47 = vpop.f32.mrb[10].mxu0  ;;  %v637_v51 = vmax.f32 %v491_v46, 0.0 }
 0x105   : > { %v638_v49 = vmax.f32 %v493_v47, 0.0  ;;  %v495_v50 = vpop.f32.mrb[11].mxu0 }
 0x106   : > { %v639_v52 = vmax.f32 %v495_v50, 0.0 }
 0x107   : > { %v696_v53 = vpack.c.bf16 %v638_v49, %v636_v48 }
 0x108   : > { %v697_v54 = vpack.c.bf16 %v639_v52, %v637_v51 }
 0x10a   : > { %v499_v55 = vpop.f32.mrb[12].mxu0  ;;  %742 = vmatprep.subr.bf16.mxu1 %v697_v54 }
 0x10b   : > { %v501_v56 = vpop.f32.mrb[13].mxu0  ;;  %743 = vmatpush1.bf16.msra.mxu1 %v696_v53  ;;  %v640_v58 = vmax.f32 %v499_v55, 0.0 }
 0x10c   : > { %v503_v57 = vpop.f32.mrb[14].mxu0  ;;  %v641_v61 = vmax.f32 %v501_v56, 0.0 }
 0x10d   : > { %v642_v59 = vmax.f32 %v503_v57, 0.0  ;;  %v505_v60 = vpop.f32.mrb[15].mxu0 }
 0x10e   : > { %v643_v62 = vmax.f32 %v505_v60, 0.0 }
 0x10f   : > { %v698_v63 = vpack.c.bf16 %v642_v59, %v640_v58 }
 0x110   : > { %v699_v7 = vpack.c.bf16 %v643_v62, %v641_v61 }
 0x112   : > { %v509_v8 = vpop.f32.mrb[16].mxu0  ;;  %744 = vmatprep.subr.bf16.mxu1 %v699_v7 }
 0x113   : > { %v511_v9 = vpop.f32.mrb[17].mxu0  ;;  %745 = vmatpush1.bf16.msra.mxu1 %v698_v63  ;;  %v644_v11 = vmax.f32 %v509_v8, 0.0 }
 0x114   : > { %v513_v10 = vpop.f32.mrb[18].mxu0  ;;  %v645_v14 = vmax.f32 %v511_v9, 0.0 }
 0x115   : > { %v646_v12 = vmax.f32 %v513_v10, 0.0  ;;  %v515_v13 = vpop.f32.mrb[19].mxu0 }
 0x116   : > { %v647_v15 = vmax.f32 %v515_v13, 0.0 }
 0x117   : > { %v700_v16 = vpack.c.bf16 %v646_v12, %v644_v11 }
 0x118   : > { %v701_v17 = vpack.c.bf16 %v647_v15, %v645_v14 }
 0x11a   : > { %v519_v18 = vpop.f32.mrb[20].mxu0  ;;  %746 = vmatprep.subr.bf16.mxu1 %v701_v17 }
 0x11b   : > { %v521_v19 = vpop.f32.mrb[21].mxu0  ;;  %747 = vmatpush1.bf16.msra.mxu1 %v700_v16  ;;  %v648_v21 = vmax.f32 %v519_v18, 0.0 }
 0x11c   : > { %v523_v20 = vpop.f32.mrb[22].mxu0  ;;  %v649_v25 = vmax.f32 %v521_v19, 0.0 }
 0x11d   : > { %v650_v22 = vmax.f32 %v523_v20, 0.0  ;;  %v525_v23 = vpop.f32.mrb[23].mxu0 }
 0x11e   : > { %v651_v26 = vmax.f32 %v525_v23, 0.0  ;;  %v725_v23 = vld [vmem:[%s4855_s3] sm:$0xff] }
 0x11f   : > { %v702_v27 = vpack.c.bf16 %v650_v22, %v648_v21  ;;  %728 = vperm.xlu0 %3929, %v725_v23   ;;  %v3970_v23 = vld [vmem:[%s4853_s1 + $0xe0] sm:$0xff]  }
 0x120   : > { %v703_v28 = vpack.c.bf16 %v651_v26, %v649_v25 }
 0x122   : > { %v529_v29 = vpop.f32.mrb[24].mxu0  ;;  %748 = vmatprep.subr.bf16.mxu1 %v703_v28 }
 0x123   : > { %v531_v30 = vpop.f32.mrb[25].mxu0  ;;  %749 = vmatpush1.bf16.msra.mxu1 %v702_v27  ;;  %v652_v32 = vmax.f32 %v529_v29, 0.0 }
 0x124   : > { %v533_v31 = vpop.f32.mrb[26].mxu0  ;;  %v653_v35 = vmax.f32 %v531_v30, 0.0 }
 0x125   : > { %v654_v33 = vmax.f32 %v533_v31, 0.0  ;;  %v535_v34 = vpop.f32.mrb[27].mxu0 }
 0x126   : > { %v655_v36 = vmax.f32 %v535_v34, 0.0 }
 0x127   : > { %v704_v37 = vpack.c.bf16 %v654_v33, %v652_v32 }
 0x128   : > { %v705_v38 = vpack.c.bf16 %v655_v36, %v653_v35 }
 0x12a   : > { %v539_v39 = vpop.f32.mrb[28].mxu0  ;;  %750 = vmatprep.subr.bf16.mxu1 %v705_v38 }
 0x12b   : > { %v541_v40 = vpop.f32.mrb[29].mxu0  ;;  %751 = vmatpush1.bf16.msra.mxu1 %v704_v37  ;;  %v656_v42 = vmax.f32 %v539_v39, 0.0 }
 0x12c   : > { %v543_v41 = vpop.f32.mrb[30].mxu0  ;;  %v657_v45 = vmax.f32 %v541_v40, 0.0 }
 0x12d   : > { %v658_v43 = vmax.f32 %v543_v41, 0.0  ;;  %v545_v44 = vpop.f32.mrb[31].mxu0 }
 0x12e   : > { %v659_v46 = vmax.f32 %v545_v44, 0.0 }
 0x12f   : > { %v706_v47 = vpack.c.bf16 %v658_v43, %v656_v42 }
 0x130   : > { %v707_v48 = vpack.c.bf16 %v659_v46, %v657_v45 }
 0x132   : > { %v549_v49 = vpop.f32.mrb[32].mxu0  ;;  %752 = vmatprep.subr.bf16.mxu1 %v707_v48 }
 0x133   : > { %v551_v50 = vpop.f32.mrb[33].mxu0  ;;  %753 = vmatpush1.bf16.msra.mxu1 %v706_v47  ;;  %v660_v52 = vmax.f32 %v549_v49, 0.0 }
 0x134   : > { %v553_v51 = vpop.f32.mrb[34].mxu0  ;;  %v661_v55 = vmax.f32 %v551_v50, 0.0 }
 0x135   : > { %v662_v53 = vmax.f32 %v553_v51, 0.0  ;;  %v555_v54 = vpop.f32.mrb[35].mxu0 }
 0x136   : > { %v663_v56 = vmax.f32 %v555_v54, 0.0 }
 0x137   : > { %v708_v57 = vpack.c.bf16 %v662_v53, %v660_v52 }
 0x138   : > { %v709_v58 = vpack.c.bf16 %v663_v56, %v661_v55 }
 0x13a   : > { %v559_v59 = vpop.f32.mrb[36].mxu0  ;;  %754 = vmatprep.subr.bf16.mxu1 %v709_v58 }
 0x13b   : > { %v561_v60 = vpop.f32.mrb[37].mxu0  ;;  %755 = vmatpush1.bf16.msra.mxu1 %v708_v57  ;;  %v664_v62 = vmax.f32 %v559_v59, 0.0 }
 0x13c   : > { %v563_v61 = vpop.f32.mrb[38].mxu0  ;;  %v665_v8 = vmax.f32 %v561_v60, 0.0 }
 0x13d   : > { %v666_v63 = vmax.f32 %v563_v61, 0.0  ;;  %v565_v7 = vpop.f32.mrb[39].mxu0 }
 0x13e   : > { %v667_v9 = vmax.f32 %v565_v7, 0.0 }
 0x13f   : > { %v710_v10 = vpack.c.bf16 %v666_v63, %v664_v62 }
 0x140   : > { %v711_v11 = vpack.c.bf16 %v667_v9, %v665_v8 }
 0x142   : > { %v569_v12 = vpop.f32.mrb[40].mxu0  ;;  %756 = vmatprep.subr.bf16.mxu1 %v711_v11 }
 0x143   : > { %v571_v13 = vpop.f32.mrb[41].mxu0  ;;  %757 = vmatpush1.bf16.msra.mxu1 %v710_v10  ;;  %v668_v15 = vmax.f32 %v569_v12, 0.0 }
 0x144   : > { %v573_v14 = vpop.f32.mrb[42].mxu0  ;;  %v669_v18 = vmax.f32 %v571_v13, 0.0 }
 0x145   : > { %v670_v16 = vmax.f32 %v573_v14, 0.0  ;;  %v575_v17 = vpop.f32.mrb[43].mxu0 }
 0x146   : > { %v671_v19 = vmax.f32 %v575_v17, 0.0  ;;  %v3562_v17 = vcombine.low %v4254_v24, %v4254_v24  ;;  %v3965_v24 = vld [vmem:[%s4853_s1 + $0xb8] sm:$0xff]  }
 0x147   : > { %v712_v20 = vpack.c.bf16 %v670_v16, %v668_v15 }
 0x148   : > { %v713_v21 = vpack.c.bf16 %v671_v19, %v669_v18  ;;  %v3958_v18 = vld [vmem:[%s4853_s1 + $0x80] sm:$0xff]  }
 0x149   : > { %v3966_v19 = vld [vmem:[%s4853_s1 + $0xc0] sm:$0xff]  }
 0x14a   : > { %v579_v22 = vpop.f32.mrb[44].mxu0  ;;  %758 = vmatprep.subr.bf16.mxu1 %v713_v21  ;;  %v3968_v21 = vld [vmem:[%s4853_s1 + $0xd0] sm:$0xff]  }
 0x14b   : > { %v581_v25 = vpop.f32.mrb[45].mxu0  ;;  %759 = vmatpush1.bf16.msra.mxu1 %v712_v20  ;;  %v672_v27 = vmax.f32 %v579_v22, 0.0  ;;  %v3967_v20 = vld [vmem:[%s4853_s1 + $0xc8] sm:$0xff]   ;;  %v3969_v22 = vld [vmem:[%s4853_s1 + $0xd8] sm:$0xff]  }
 0x14c   : > { %v583_v26 = vpop.f32.mrb[46].mxu0  ;;  %v673_v30 = vmax.f32 %v581_v25, 0.0  ;;  %v3971_v25 = vld [vmem:[%s4853_s1 + $0xe8] sm:$0xff]  }
 0x14d   : > { %v674_v28 = vmax.f32 %v583_v26, 0.0  ;;  %v585_v29 = vpop.f32.mrb[47].mxu0  ;;  %v3972_v26 = vld [vmem:[%s4853_s1 + $0xf0] sm:$0xff]  }
 0x14e   : > { %v675_v31 = vmax.f32 %v585_v29, 0.0 }
 0x14f   : > { %v714_v32 = vpack.c.bf16 %v674_v28, %v672_v27  ;;  %v3973_v27 = vld [vmem:[%s4853_s1 + $0xf8] sm:$0xff]  }
 0x150   : > { %v715_v33 = vpack.c.bf16 %v675_v31, %v673_v30 }
 0x152   : > { %v589_v34 = vpop.f32.mrb[48].mxu0  ;;  %760 = vmatprep.subr.bf16.mxu1 %v715_v33 }
 0x153   : > { %v591_v35 = vpop.f32.mrb[49].mxu0  ;;  %761 = vmatpush1.bf16.msra.mxu1 %v714_v32  ;;  %v676_v37 = vmax.f32 %v589_v34, 0.0 }
 0x154   : > { %v593_v36 = vpop.f32.mrb[50].mxu0  ;;  %v677_v40 = vmax.f32 %v591_v35, 0.0 }
 0x155   : > { %v678_v38 = vmax.f32 %v593_v36, 0.0  ;;  %v595_v39 = vpop.f32.mrb[51].mxu0  ;;  %v4360_v36 = vld [vmem:[%s4854_s2 + $0x8] sm:$0xff] }
 0x156   : > { %v679_v41 = vmax.f32 %v595_v39, 0.0 }
 0x157   : > { %v716_v42 = vpack.c.bf16 %v678_v38, %v676_v37  ;;  %v3629_v38 = vcombine.high %v4360_v36, %v4360_v36 }
 0x158   : > { %v717_v43 = vpack.c.bf16 %v679_v41, %v677_v40 }
 0x159   : > { %1277 = vmatprep.mubr.bf16.mxu0 %v3629_v38 }
 0x15a   : > { %v599_v44 = vpop.f32.mrb[52].mxu0  ;;  %762 = vmatprep.subr.bf16.mxu1 %v717_v43 }
 0x15b   : > { %v601_v45 = vpop.f32.mrb[53].mxu0  ;;  %763 = vmatpush1.bf16.msra.mxu1 %v716_v42  ;;  %v680_v47 = vmax.f32 %v599_v44, 0.0 }
 0x15c   : > { %v603_v46 = vpop.f32.mrb[54].mxu0  ;;  %v681_v50 = vmax.f32 %v601_v45, 0.0 }
 0x15d   : > { %v682_v48 = vmax.f32 %v603_v46, 0.0  ;;  %v605_v49 = vpop.f32.mrb[55].mxu0 }
 0x15e   : > { %v683_v51 = vmax.f32 %v605_v49, 0.0 }
 0x15f   : > { %v718_v52 = vpack.c.bf16 %v682_v48, %v680_v47 }
 0x160   : > { %v719_v53 = vpack.c.bf16 %v683_v51, %v681_v50 }
 0x162   : > { %v609_v54 = vpop.f32.mrb[56].mxu0  ;;  %764 = vmatprep.subr.bf16.mxu1 %v719_v53 }
 0x163   : > { %v611_v55 = vpop.f32.mrb[57].mxu0  ;;  %765 = vmatpush1.bf16.msra.mxu1 %v718_v52  ;;  %v684_v57 = vmax.f32 %v609_v54, 0.0 }
 0x164   : > { %v613_v56 = vpop.f32.mrb[58].mxu0  ;;  %v685_v60 = vmax.f32 %v611_v55, 0.0 }
 0x165   : > { %v686_v58 = vmax.f32 %v613_v56, 0.0  ;;  %v615_v59 = vpop.f32.mrb[59].mxu0 }
 0x166   : > { %v687_v61 = vmax.f32 %v615_v59, 0.0 }
 0x167   : > { %v720_v62 = vpack.c.bf16 %v686_v58, %v684_v57 }
 0x168   : > { %v721_v63 = vpack.c.bf16 %v687_v61, %v685_v60 }
 0x16a   : > { %v619_v7 = vpop.f32.mrb[60].mxu0  ;;  %766 = vmatprep.subr.bf16.mxu1 %v721_v63 }
 0x16b   : > { %v621_v8 = vpop.f32.mrb[61].mxu0  ;;  %767 = vmatpush1.bf16.msra.mxu1 %v720_v62  ;;  %v688_v10 = vmax.f32 %v619_v7, 0.0 }
 0x16c   : > { %v623_v9 = vpop.f32.mrb[62].mxu0  ;;  %v689_v13 = vmax.f32 %v621_v8, 0.0 }
 0x16d   : > { %v690_v11 = vmax.f32 %v623_v9, 0.0  ;;  %v625_v12 = vpop.f32.mrb[63].mxu0 }
 0x16e   : > { %v691_v14 = vmax.f32 %v625_v12, 0.0 }
 0x16f   : > { %v722_v15 = vpack.c.bf16 %v690_v11, %v688_v10 }
 0x170   : > { %v723_v16 = vpack.c.bf16 %v691_v14, %v689_v13 }
 0x172   : > { %768 = vmatprep.subr.bf16.mxu1 %v723_v16 }
 0x173   : > { %769 = vmatpush1.bf16.msra.mxu1 %v722_v15 }
 0x174   : > { %942 = vmatprep.subr.bf16.mxu1 %v4149_v1  ;;  %v3959_v1 = vld [vmem:[%s4853_s1 + $0x88] sm:$0xff]  }
 0x176   : > { %771 = vmatmul.mubr.bf16.vlgmr.msra.gmra.mrb[0].mxu1 %v3562_v17 }
 0x177   : > { %943 = vmatpush1.bf16.msra.mxu1 %v4152_v2  ;;  %974 = vmatprep.mubr.bf16.mxu1 %v4093_v0  ;;  %v3960_v2 = vld [vmem:[%s4853_s1 + $0x90] sm:$0xff]  }
 0x178   : > { %944 = vmatprep.subr.bf16.mxu1 %v4156_v3  ;;  %v3961_v3 = vld [vmem:[%s4853_s1 + $0x98] sm:$0xff]  }
 0x17b   : > { %945 = vmatpush1.bf16.msra.mxu1 %v4160_v4  ;;  %v3962_v4 = vld [vmem:[%s4853_s1 + $0xa0] sm:$0xff]  }
 0x17c   : > { %946 = vmatprep.subr.bf16.mxu1 %v4164_v5  ;;  %v3963_v5 = vld [vmem:[%s4853_s1 + $0xa8] sm:$0xff]  }
 0x17f   : > { %947 = vmatpush1.bf16.msra.mxu1 %v4168_v6  ;;  %v3964_v6 = vld [vmem:[%s4853_s1 + $0xb0] sm:$0xff]  }
 0x182   : > { %3612 = vmatmul.mubr.msk.bf16.vlgmr.msra.gmra.mrb[4].mxu1 %vm386_vm0, %v3958_v18 }
 0x183   : > { %984 = vmatprep.mubr.bf16.mxu1 %v4093_v0 }
 0x18a   : > { %3613 = vmatmul.mubr.msk.bf16.gmra.mrb[8].mxu1 %vm386_vm0, %v3959_v1 }
 0x18b   : > { %994 = vmatprep.mubr.bf16.mxu1 %v4093_v0 }
 0x192   : > { %3614 = vmatmul.mubr.msk.bf16.gmra.mrb[12].mxu1 %vm386_vm0, %v3960_v2 }
 0x193   : > { %1004 = vmatprep.mubr.bf16.mxu1 %v4093_v0 }
 0x19a   : > { %3615 = vmatmul.mubr.msk.bf16.gmra.mrb[16].mxu1 %vm386_vm0, %v3961_v3 }
 0x19b   : > { %1014 = vmatprep.mubr.bf16.mxu1 %v4093_v0 }
 0x19e   : > { %v729_v28 = vpop.permute.xlu0 %728 }
 0x1a2   : > { %3616 = vmatmul.mubr.msk.bf16.gmra.mrb[20].mxu1 %vm386_vm0, %v3962_v4 }
 0x1a3   : > { %1024 = vmatprep.mubr.bf16.mxu1 %v4093_v0 }
 0x1aa   : > { %3617 = vmatmul.mubr.msk.bf16.gmra.mrb[24].mxu1 %vm386_vm0, %v3963_v5 }
 0x1ab   : > { %1034 = vmatprep.mubr.bf16.mxu1 %v4093_v0 }
 0x1b2   : > { %3618 = vmatmul.mubr.msk.bf16.gmra.mrb[28].mxu1 %vm386_vm0, %v3964_v6 }
 0x1b3   : > { %1044 = vmatprep.mubr.bf16.mxu1 %v4093_v0 }
 0x1ba   : > { %3619 = vmatmul.mubr.msk.bf16.gmra.mrb[32].mxu1 %vm386_vm0, %v3965_v24 }
 0x1bb   : > { %1054 = vmatprep.mubr.bf16.mxu1 %v4093_v0 }
 0x1c2   : > { %3620 = vmatmul.mubr.msk.bf16.gmra.mrb[36].mxu1 %vm386_vm0, %v3966_v19 }
 0x1c3   : > { %1064 = vmatprep.mubr.bf16.mxu1 %v4093_v0 }
 0x1ca   : > { %3621 = vmatmul.mubr.msk.bf16.gmra.mrb[40].mxu1 %vm386_vm0, %v3967_v20 }
 0x1cb   : > { %1074 = vmatprep.mubr.bf16.mxu1 %v4093_v0 }
 0x1d2   : > { %3622 = vmatmul.mubr.msk.bf16.gmra.mrb[44].mxu1 %vm386_vm0, %v3968_v21 }
 0x1d3   : > { %1084 = vmatprep.mubr.bf16.mxu1 %v4093_v0 }
 0x1da   : > { %3623 = vmatmul.mubr.msk.bf16.gmra.mrb[48].mxu1 %vm386_vm0, %v3969_v22 }
 0x1db   : > { %1094 = vmatprep.mubr.bf16.mxu1 %v4093_v0 }
 0x1e2   : > { %3624 = vmatmul.mubr.msk.bf16.gmra.mrb[52].mxu1 %vm386_vm0, %v3970_v23 }
 0x1e3   : > { %1104 = vmatprep.mubr.bf16.mxu1 %v4093_v0 }
 0x1ea   : > { %3625 = vmatmul.mubr.msk.bf16.gmra.mrb[56].mxu1 %vm386_vm0, %v3971_v25 }
 0x1eb   : > { %1114 = vmatprep.mubr.bf16.mxu1 %v4093_v0 }
 0x1f2   : > { %3626 = vmatmul.mubr.msk.bf16.gmra.mrb[60].mxu1 %vm386_vm0, %v3972_v26 }
 0x1f3   : > { %1124 = vmatprep.mubr.bf16.mxu1 %v4093_v0 }
 0x1fa   : > { %3627 = vmatmul.mubr.msk.bf16.gmra.mrb[64].mxu1 %vm386_vm0, %v3973_v27 }
 0x249   : > { %v772_v29 = vpop.f32.mrb[0].mxu1 }
 0x24a   : > { %v773_v30 = vadd.f32 %v772_v29, %v729_v28  ;;  %v774_v31 = vpop.f32.mrb[1].mxu1 }
 0x24b   : > { %v775_v32 = vadd.f32 %v774_v31, %v729_v28  ;;  %v776_v33 = vpop.f32.mrb[2].mxu1 }
 0x24c   : > { %779 = vst [vmem:[%s4353_s5] sm:$0xff] %v773_v30  ;;  %v777_v34 = vpop.f32.mrb[3].mxu1 }
 0x24d   : > { %780 = vst [vmem:[%s4353_s5 + $0x8] sm:$0xff] %v775_v32 }
 0x255   : > { %v976_v35 = vpop.f32.mrb[4].mxu1 }
 0x256   : > { %v978_v37 = vpop.f32.mrb[5].mxu1  ;;  %v1135_v40 = vmax.f32 %v976_v35, 0.0 }
 0x257   : > { %v980_v39 = vpop.f32.mrb[6].mxu1  ;;  %v1136_v43 = vmax.f32 %v978_v37, 0.0 }
 0x258   : > { %v1137_v41 = vmax.f32 %v980_v39, 0.0  ;;  %v982_v42 = vpop.f32.mrb[7].mxu1 }
 0x259   : > { %v1138_v44 = vmax.f32 %v982_v42, 0.0 }
 0x25a   : > { %v1199_v45 = vpack.c.bf16 %v1137_v41, %v1135_v40 }
 0x25b   : > { %v1200_v46 = vpack.c.bf16 %v1138_v44, %v1136_v43 }
 0x25d   : > { %v986_v47 = vpop.f32.mrb[8].mxu1  ;;  %1245 = vmatprep.subr.bf16.mxu0 %v1200_v46 }
 0x25e   : > { %v988_v48 = vpop.f32.mrb[9].mxu1  ;;  %1246 = vmatpush1.bf16.msra.mxu0 %v1199_v45  ;;  %v1139_v50 = vmax.f32 %v986_v47, 0.0 }
 0x25f   : > { %v990_v49 = vpop.f32.mrb[10].mxu1  ;;  %v1140_v53 = vmax.f32 %v988_v48, 0.0 }
 0x260   : > { %v1141_v51 = vmax.f32 %v990_v49, 0.0  ;;  %v992_v52 = vpop.f32.mrb[11].mxu1 }
 0x261   : > { %v1142_v54 = vmax.f32 %v992_v52, 0.0 }
 0x262   : > { %v1201_v55 = vpack.c.bf16 %v1141_v51, %v1139_v50 }
 0x263   : > { %v1202_v56 = vpack.c.bf16 %v1142_v54, %v1140_v53 }
 0x265   : > { %v996_v57 = vpop.f32.mrb[12].mxu1  ;;  %1247 = vmatprep.subr.bf16.mxu0 %v1202_v56 }
 0x266   : > { %v998_v58 = vpop.f32.mrb[13].mxu1  ;;  %1248 = vmatpush1.bf16.msra.mxu0 %v1201_v55  ;;  %v1143_v60 = vmax.f32 %v996_v57, 0.0 }
 0x267   : > { %v1000_v59 = vpop.f32.mrb[14].mxu1  ;;  %v1144_v63 = vmax.f32 %v998_v58, 0.0 }
 0x268   : > { %v1145_v61 = vmax.f32 %v1000_v59, 0.0  ;;  %v1002_v62 = vpop.f32.mrb[15].mxu1 }
 0x269   : > { %v1146_v7 = vmax.f32 %v1002_v62, 0.0 }
 0x26a   : > { %v1203_v8 = vpack.c.bf16 %v1145_v61, %v1143_v60 }
 0x26b   : > { %v1204_v9 = vpack.c.bf16 %v1146_v7, %v1144_v63 }
 0x26d   : > { %v1006_v10 = vpop.f32.mrb[16].mxu1  ;;  %1249 = vmatprep.subr.bf16.mxu0 %v1204_v9 }
 0x26e   : > { %v1008_v11 = vpop.f32.mrb[17].mxu1  ;;  %1250 = vmatpush1.bf16.msra.mxu0 %v1203_v8  ;;  %v1147_v13 = vmax.f32 %v1006_v10, 0.0 }
 0x26f   : > { %v1010_v12 = vpop.f32.mrb[18].mxu1  ;;  %v1148_v16 = vmax.f32 %v1008_v11, 0.0 }
 0x270   : > { %v1149_v14 = vmax.f32 %v1010_v12, 0.0  ;;  %v1012_v15 = vpop.f32.mrb[19].mxu1 }
 0x271   : > { %v1150_v17 = vmax.f32 %v1012_v15, 0.0 }
 0x272   : > { %v1205_v18 = vpack.c.bf16 %v1149_v14, %v1147_v13 }
 0x273   : > { %v1206_v1 = vpack.c.bf16 %v1150_v17, %v1148_v16 }
 0x275   : > { %v1016_v2 = vpop.f32.mrb[20].mxu1  ;;  %1251 = vmatprep.subr.bf16.mxu0 %v1206_v1 }
 0x276   : > { %v1018_v3 = vpop.f32.mrb[21].mxu1  ;;  %1252 = vmatpush1.bf16.msra.mxu0 %v1205_v18  ;;  %v1151_v5 = vmax.f32 %v1016_v2, 0.0 }
 0x277   : > { %v1020_v4 = vpop.f32.mrb[22].mxu1  ;;  %v1152_v19 = vmax.f32 %v1018_v3, 0.0 }
 0x278   : > { %v1153_v6 = vmax.f32 %v1020_v4, 0.0  ;;  %v1022_v24 = vpop.f32.mrb[23].mxu1 }
 0x279   : > { %v1154_v20 = vmax.f32 %v1022_v24, 0.0 }
 0x27a   : > { %v1207_v21 = vpack.c.bf16 %v1153_v6, %v1151_v5 }
 0x27b   : > { %v1208_v22 = vpack.c.bf16 %v1154_v20, %v1152_v19 }
 0x27d   : > { %v1026_v23 = vpop.f32.mrb[24].mxu1  ;;  %1253 = vmatprep.subr.bf16.mxu0 %v1208_v22  ;;  %v1232_v22 = vld [vmem:[%s4855_s3 + $0x8] sm:$0xff] }
 0x27e   : > { %v1028_v25 = vpop.f32.mrb[25].mxu1  ;;  %1254 = vmatpush1.bf16.msra.mxu0 %v1207_v21  ;;  %v1155_v27 = vmax.f32 %v1026_v23, 0.0  ;;  %1235 = vperm.xlu0 %3929, %v1232_v22   ;;  %v3982_v22 = vld [vmem:[%s4853_s1 + $0x130] sm:$0xff]  }
 0x27f   : > { %v1030_v26 = vpop.f32.mrb[26].mxu1  ;;  %v1156_v30 = vmax.f32 %v1028_v25, 0.0 }
 0x280   : > { %v1157_v28 = vmax.f32 %v1030_v26, 0.0  ;;  %v1032_v29 = vpop.f32.mrb[27].mxu1 }
 0x281   : > { %v1158_v31 = vmax.f32 %v1032_v29, 0.0 }
 0x282   : > { %v1209_v32 = vpack.c.bf16 %v1157_v28, %v1155_v27 }
 0x283   : > { %v1210_v33 = vpack.c.bf16 %v1158_v31, %v1156_v30 }
 0x285   : > { %v1036_v34 = vpop.f32.mrb[28].mxu1  ;;  %1255 = vmatprep.subr.bf16.mxu0 %v1210_v33 }
 0x286   : > { %v1038_v35 = vpop.f32.mrb[29].mxu1  ;;  %1256 = vmatpush1.bf16.msra.mxu0 %v1209_v32  ;;  %v1159_v38 = vmax.f32 %v1036_v34, 0.0 }
 0x287   : > { %v1040_v37 = vpop.f32.mrb[30].mxu1  ;;  %v1160_v41 = vmax.f32 %v1038_v35, 0.0 }
 0x288   : > { %v1161_v39 = vmax.f32 %v1040_v37, 0.0  ;;  %v1042_v40 = vpop.f32.mrb[31].mxu1 }
 0x289   : > { %v1162_v42 = vmax.f32 %v1042_v40, 0.0 }
 0x28a   : > { %v1211_v43 = vpack.c.bf16 %v1161_v39, %v1159_v38 }
 0x28b   : > { %v1212_v44 = vpack.c.bf16 %v1162_v42, %v1160_v41 }
 0x28d   : > { %v1046_v45 = vpop.f32.mrb[32].mxu1  ;;  %1257 = vmatprep.subr.bf16.mxu0 %v1212_v44 }
 0x28e   : > { %v1048_v46 = vpop.f32.mrb[33].mxu1  ;;  %1258 = vmatpush1.bf16.msra.mxu0 %v1211_v43  ;;  %v1163_v48 = vmax.f32 %v1046_v45, 0.0 }
 0x28f   : > { %v1050_v47 = vpop.f32.mrb[34].mxu1  ;;  %v1164_v51 = vmax.f32 %v1048_v46, 0.0 }
 0x290   : > { %v1165_v49 = vmax.f32 %v1050_v47, 0.0  ;;  %v1052_v50 = vpop.f32.mrb[35].mxu1 }
 0x291   : > { %v1166_v52 = vmax.f32 %v1052_v50, 0.0 }
 0x292   : > { %v1213_v53 = vpack.c.bf16 %v1165_v49, %v1163_v48 }
 0x293   : > { %v1214_v54 = vpack.c.bf16 %v1166_v52, %v1164_v51 }
 0x295   : > { %v1056_v55 = vpop.f32.mrb[36].mxu1  ;;  %1259 = vmatprep.subr.bf16.mxu0 %v1214_v54 }
 0x296   : > { %v1058_v56 = vpop.f32.mrb[37].mxu1  ;;  %1260 = vmatpush1.bf16.msra.mxu0 %v1213_v53  ;;  %v1167_v58 = vmax.f32 %v1056_v55, 0.0 }
 0x297   : > { %v1060_v57 = vpop.f32.mrb[38].mxu1  ;;  %v1168_v61 = vmax.f32 %v1058_v56, 0.0 }
 0x298   : > { %v1169_v59 = vmax.f32 %v1060_v57, 0.0  ;;  %v1062_v60 = vpop.f32.mrb[39].mxu1 }
 0x299   : > { %v1170_v62 = vmax.f32 %v1062_v60, 0.0 }
 0x29a   : > { %v1215_v63 = vpack.c.bf16 %v1169_v59, %v1167_v58 }
 0x29b   : > { %v1216_v7 = vpack.c.bf16 %v1170_v62, %v1168_v61 }
 0x29d   : > { %v1066_v8 = vpop.f32.mrb[40].mxu1  ;;  %1261 = vmatprep.subr.bf16.mxu0 %v1216_v7 }
 0x29e   : > { %v1068_v9 = vpop.f32.mrb[41].mxu1  ;;  %1262 = vmatpush1.bf16.msra.mxu0 %v1215_v63  ;;  %v1171_v11 = vmax.f32 %v1066_v8, 0.0 }
 0x29f   : > { %v1070_v10 = vpop.f32.mrb[42].mxu1  ;;  %v1172_v14 = vmax.f32 %v1068_v9, 0.0 }
 0x2a0   : > { %v1173_v12 = vmax.f32 %v1070_v10, 0.0  ;;  %v1072_v13 = vpop.f32.mrb[43].mxu1 }
 0x2a1   : > { %v1174_v15 = vmax.f32 %v1072_v13, 0.0 }
 0x2a2   : > { %v1217_v16 = vpack.c.bf16 %v1173_v12, %v1171_v11 }
 0x2a3   : > { %v1218_v17 = vpack.c.bf16 %v1174_v15, %v1172_v14 }
 0x2a5   : > { %v1076_v18 = vpop.f32.mrb[44].mxu1  ;;  %1263 = vmatprep.subr.bf16.mxu0 %v1218_v17  ;;  %v3628_v17 = vcombine.low %v4360_v36, %v4360_v36  ;;  %v4387_v36 = vld [vmem:[%s4146_s22 + $0x24] ss:$8 sps:$4 sm:$0xff]  }
 0x2a6   : > { %v1078_v1 = vpop.f32.mrb[45].mxu1  ;;  %1264 = vmatpush1.bf16.msra.mxu0 %v1217_v16  ;;  %v1175_v3 = vmax.f32 %v1076_v18, 0.0  ;;  %v4370_v18 = vld [vmem:[%s4146_s22 + $0x4] ss:$8 sps:$4 sm:$0xff]  }
 0x2a7   : > { %v1080_v2 = vpop.f32.mrb[46].mxu1  ;;  %v1176_v6 = vmax.f32 %v1078_v1, 0.0  ;;  %v4374_v1 = vld [vmem:[%s4146_s22] ss:$8 sps:$4 sm:$0xff]  }
 0x2a8   : > { %v1177_v4 = vmax.f32 %v1080_v2, 0.0  ;;  %v1082_v5 = vpop.f32.mrb[47].mxu1  ;;  %v4379_v2 = vld [vmem:[%s4146_s22 + $0x14] ss:$8 sps:$4 sm:$0xff]  }
 0x2a9   : > { %v1178_v24 = vmax.f32 %v1082_v5, 0.0  ;;  %v4394_v5 = vld [vmem:[%s4146_s22 + $0x20] ss:$8 sps:$4 sm:$0xff]  }
 0x2aa   : > { %v1219_v19 = vpack.c.bf16 %v1177_v4, %v1175_v3  ;;  %v4383_v3 = vld [vmem:[%s4146_s22 + $0x10] ss:$8 sps:$4 sm:$0xff]   ;;  %v3976_v4 = vld [vmem:[%s4853_s1 + $0x100] sm:$0xff]  }
 0x2ab   : > { %v1220_v20 = vpack.c.bf16 %v1178_v24, %v1176_v6  ;;  %v3977_v6 = vld [vmem:[%s4853_s1 + $0x108] sm:$0xff]   ;;  %v3978_v24 = vld [vmem:[%s4853_s1 + $0x110] sm:$0xff]  }
 0x2ad   : > { %v1086_v21 = vpop.f32.mrb[48].mxu1  ;;  %1265 = vmatprep.subr.bf16.mxu0 %v1220_v20  ;;  %v3980_v20 = vld [vmem:[%s4853_s1 + $0x120] sm:$0xff]  }
 0x2ae   : > { %v1088_v23 = vpop.f32.mrb[49].mxu1  ;;  %1266 = vmatpush1.bf16.msra.mxu0 %v1219_v19  ;;  %v1179_v26 = vmax.f32 %v1086_v21, 0.0  ;;  %v3979_v19 = vld [vmem:[%s4853_s1 + $0x118] sm:$0xff]   ;;  %v3981_v21 = vld [vmem:[%s4853_s1 + $0x128] sm:$0xff]  }
 0x2af   : > { %v1090_v25 = vpop.f32.mrb[50].mxu1  ;;  %v1180_v29 = vmax.f32 %v1088_v23, 0.0  ;;  %v3983_v23 = vld [vmem:[%s4853_s1 + $0x138] sm:$0xff]  }
 0x2b0   : > { %v1181_v27 = vmax.f32 %v1090_v25, 0.0  ;;  %v1092_v28 = vpop.f32.mrb[51].mxu1  ;;  %v3984_v25 = vld [vmem:[%s4853_s1 + $0x140] sm:$0xff]  }
 0x2b1   : > { %v1182_v30 = vmax.f32 %v1092_v28, 0.0  ;;  %v3987_v28 = vld [vmem:[%s4853_s1 + $0x158] sm:$0xff]  }
 0x2b2   : > { %v1221_v31 = vpack.c.bf16 %v1181_v27, %v1179_v26  ;;  %v3985_v26 = vld [vmem:[%s4853_s1 + $0x148] sm:$0xff]   ;;  %v3986_v27 = vld [vmem:[%s4853_s1 + $0x150] sm:$0xff]  }
 0x2b3   : > { %v1222_v32 = vpack.c.bf16 %v1182_v30, %v1180_v29  ;;  %v3988_v29 = vld [vmem:[%s4853_s1 + $0x160] sm:$0xff]   ;;  %v3989_v30 = vld [vmem:[%s4853_s1 + $0x168] sm:$0xff]  }
 0x2b5   : > { %v1096_v33 = vpop.f32.mrb[52].mxu1  ;;  %1267 = vmatprep.subr.bf16.mxu0 %v1222_v32  ;;  %v3991_v32 = vld [vmem:[%s4853_s1 + $0x178] sm:$0xff]  }
 0x2b6   : > { %v1098_v34 = vpop.f32.mrb[53].mxu1  ;;  %1268 = vmatpush1.bf16.msra.mxu0 %v1221_v31  ;;  %v1183_v37 = vmax.f32 %v1096_v33, 0.0  ;;  %v3990_v31 = vld [vmem:[%s4853_s1 + $0x170] sm:$0xff]  }
 0x2b7   : > { %v1100_v35 = vpop.f32.mrb[54].mxu1  ;;  %v1184_v40 = vmax.f32 %v1098_v34, 0.0 }
 0x2b8   : > { %v1185_v38 = vmax.f32 %v1100_v35, 0.0  ;;  %v1102_v39 = vpop.f32.mrb[55].mxu1 }
 0x2b9   : > { %v1186_v41 = vmax.f32 %v1102_v39, 0.0 }
 0x2ba   : > { %v1223_v42 = vpack.c.bf16 %v1185_v38, %v1183_v37 }
 0x2bb   : > { %v1224_v43 = vpack.c.bf16 %v1186_v41, %v1184_v40 }
 0x2bd   : > { %v1106_v44 = vpop.f32.mrb[56].mxu1  ;;  %1269 = vmatprep.subr.bf16.mxu0 %v1224_v43 }
 0x2be   : > { %v1108_v45 = vpop.f32.mrb[57].mxu1  ;;  %1270 = vmatpush1.bf16.msra.mxu0 %v1223_v42  ;;  %v1187_v47 = vmax.f32 %v1106_v44, 0.0  ;;  %v4478_v42 = vld [vmem:[%s4854_s2 + $0x10] sm:$0xff] }
 0x2bf   : > { %v1110_v46 = vpop.f32.mrb[58].mxu1  ;;  %v1188_v50 = vmax.f32 %v1108_v45, 0.0  ;;  %v3695_v44 = vcombine.high %v4478_v42, %v4478_v42 }
 0x2c0   : > { %v1189_v48 = vmax.f32 %v1110_v46, 0.0  ;;  %v1112_v49 = vpop.f32.mrb[59].mxu1 }
 0x2c1   : > { %v1190_v51 = vmax.f32 %v1112_v49, 0.0  ;;  %1784 = vmatprep.mubr.bf16.mxu1 %v3695_v44 }
 0x2c2   : > { %v1225_v52 = vpack.c.bf16 %v1189_v48, %v1187_v47 }
 0x2c3   : > { %v1226_v53 = vpack.c.bf16 %v1190_v51, %v1188_v50 }
 0x2c5   : > { %v1116_v54 = vpop.f32.mrb[60].mxu1  ;;  %1271 = vmatprep.subr.bf16.mxu0 %v1226_v53 }
 0x2c6   : > { %v1118_v55 = vpop.f32.mrb[61].mxu1  ;;  %1272 = vmatpush1.bf16.msra.mxu0 %v1225_v52  ;;  %v1191_v57 = vmax.f32 %v1116_v54, 0.0 }
 0x2c7   : > { %v1120_v56 = vpop.f32.mrb[62].mxu1  ;;  %v1192_v60 = vmax.f32 %v1118_v55, 0.0 }
 0x2c8   : > { %v1193_v58 = vmax.f32 %v1120_v56, 0.0  ;;  %v1122_v59 = vpop.f32.mrb[63].mxu1 }
 0x2c9   : > { %v1194_v61 = vmax.f32 %v1122_v59, 0.0 }
 0x2ca   : > { %v1227_v62 = vpack.c.bf16 %v1193_v58, %v1191_v57 }
 0x2cb   : > { %v1228_v63 = vpack.c.bf16 %v1194_v61, %v1192_v60 }
 0x2cd   : > { %v1126_v7 = vpop.f32.mrb[64].mxu1  ;;  %1273 = vmatprep.subr.bf16.mxu0 %v1228_v63 }
 0x2ce   : > { %v1128_v8 = vpop.f32.mrb[65].mxu1  ;;  %1274 = vmatpush1.bf16.msra.mxu0 %v1227_v62  ;;  %v1195_v10 = vmax.f32 %v1126_v7, 0.0 }
 0x2cf   : > { %v1130_v9 = vpop.f32.mrb[66].mxu1  ;;  %v1196_v13 = vmax.f32 %v1128_v8, 0.0 }
 0x2d0   : > { %v1197_v11 = vmax.f32 %v1130_v9, 0.0  ;;  %v1132_v12 = vpop.f32.mrb[67].mxu1 }
 0x2d1   : > { %v1198_v14 = vmax.f32 %v1132_v12, 0.0 }
 0x2d2   : > { %v1229_v15 = vpack.c.bf16 %v1197_v11, %v1195_v10 }
 0x2d3   : > { %v1230_v16 = vpack.c.bf16 %v1198_v14, %v1196_v13 }
 0x2d5   : > { %1275 = vmatprep.subr.bf16.mxu0 %v1230_v16 }
 0x2d6   : > { %1276 = vmatpush1.bf16.msra.mxu0 %v1229_v15 }
 0x2d7   : > { %1449 = vmatprep.subr.bf16.mxu0 %v4370_v18 }
 0x2d9   : > { %1278 = vmatmul.mubr.bf16.vlgmr.msra.gmra.mrb[64].mxu0 %v3628_v17 }
 0x2da   : > { %1450 = vmatpush1.bf16.msra.mxu0 %v4374_v1  ;;  %1481 = vmatprep.mubr.bf16.mxu0 %v4093_v0 }
 0x2db   : > { %1451 = vmatprep.subr.bf16.mxu0 %v4379_v2 }
 0x2de   : > { %1452 = vmatpush1.bf16.msra.mxu0 %v4383_v3 }
 0x2df   : > { %1453 = vmatprep.subr.bf16.mxu0 %v4387_v36 }
 0x2e2   : > { %1454 = vmatpush1.bf16.msra.mxu0 %v4394_v5 }
 0x2e5   : > { %3678 = vmatmul.mubr.msk.bf16.vlgmr.msra.gmra.mrb[68].mxu0 %vm386_vm0, %v3976_v4 }
 0x2e6   : > { %1491 = vmatprep.mubr.bf16.mxu0 %v4093_v0 }
 0x2ed   : > { %3679 = vmatmul.mubr.msk.bf16.gmra.mrb[72].mxu0 %vm386_vm0, %v3977_v6 }
 0x2ee   : > { %1501 = vmatprep.mubr.bf16.mxu0 %v4093_v0 }
 0x2f5   : > { %3680 = vmatmul.mubr.msk.bf16.gmra.mrb[76].mxu0 %vm386_vm0, %v3978_v24 }
 0x2f6   : > { %1511 = vmatprep.mubr.bf16.mxu0 %v4093_v0 }
 0x2fd   : > { %3681 = vmatmul.mubr.msk.bf16.gmra.mrb[80].mxu0 %vm386_vm0, %v3979_v19  ;;  %v1236_v33 = vpop.permute.xlu0 %1235 }
 0x2fe   : > { %1521 = vmatprep.mubr.bf16.mxu0 %v4093_v0 }
 0x305   : > { %3682 = vmatmul.mubr.msk.bf16.gmra.mrb[84].mxu0 %vm386_vm0, %v3980_v20 }
 0x306   : > { %1531 = vmatprep.mubr.bf16.mxu0 %v4093_v0 }
 0x30d   : > { %3683 = vmatmul.mubr.msk.bf16.gmra.mrb[88].mxu0 %vm386_vm0, %v3981_v21 }
 0x30e   : > { %1541 = vmatprep.mubr.bf16.mxu0 %v4093_v0 }
 0x315   : > { %3684 = vmatmul.mubr.msk.bf16.gmra.mrb[92].mxu0 %vm386_vm0, %v3982_v22 }
 0x316   : > { %1551 = vmatprep.mubr.bf16.mxu0 %v4093_v0 }
 0x31d   : > { %3685 = vmatmul.mubr.msk.bf16.gmra.mrb[96].mxu0 %vm386_vm0, %v3983_v23 }
 0x31e   : > { %1561 = vmatprep.mubr.bf16.mxu0 %v4093_v0 }
 0x325   : > { %3686 = vmatmul.mubr.msk.bf16.gmra.mrb[100].mxu0 %vm386_vm0, %v3984_v25 }
 0x326   : > { %1571 = vmatprep.mubr.bf16.mxu0 %v4093_v0 }
 0x32d   : > { %3687 = vmatmul.mubr.msk.bf16.gmra.mrb[104].mxu0 %vm386_vm0, %v3985_v26 }
 0x32e   : > { %1581 = vmatprep.mubr.bf16.mxu0 %v4093_v0 }
 0x335   : > { %3688 = vmatmul.mubr.msk.bf16.gmra.mrb[108].mxu0 %vm386_vm0, %v3986_v27 }
 0x336   : > { %1591 = vmatprep.mubr.bf16.mxu0 %v4093_v0 }
 0x33d   : > { %3689 = vmatmul.mubr.msk.bf16.gmra.mrb[112].mxu0 %vm386_vm0, %v3987_v28 }
 0x33e   : > { %1601 = vmatprep.mubr.bf16.mxu0 %v4093_v0 }
 0x345   : > { %3690 = vmatmul.mubr.msk.bf16.gmra.mrb[116].mxu0 %vm386_vm0, %v3988_v29 }
 0x346   : > { %1611 = vmatprep.mubr.bf16.mxu0 %v4093_v0 }
 0x34d   : > { %3691 = vmatmul.mubr.msk.bf16.gmra.mrb[120].mxu0 %vm386_vm0, %v3989_v30 }
 0x34e   : > { %1621 = vmatprep.mubr.bf16.mxu0 %v4093_v0 }
 0x355   : > { %3692 = vmatmul.mubr.msk.bf16.gmra.mrb[124].mxu0 %vm386_vm0, %v3990_v31 }
 0x356   : > { %1631 = vmatprep.mubr.bf16.mxu0 %v4093_v0 }
 0x35d   : > { %3693 = vmatmul.mubr.msk.bf16.gmra.mrb[128].mxu0 %vm386_vm0, %v3991_v32 }
 0x3ac   : > { %v1279_v34 = vpop.f32.mrb[64].mxu0 }
 0x3ad   : > { %v1280_v35 = vadd.f32 %v1279_v34, %v1236_v33  ;;  %v1281_v37 = vpop.f32.mrb[65].mxu0 }
 0x3ae   : > { %v1282_v38 = vadd.f32 %v1281_v37, %v1236_v33  ;;  %v1283_v39 = vpop.f32.mrb[66].mxu0 }
 0x3af   : > { %1286 = vst [vmem:[%s4353_s5 + $0x10] sm:$0xff] %v1280_v35  ;;  %v1284_v40 = vpop.f32.mrb[67].mxu0 }
 0x3b0   : > { %1287 = vst [vmem:[%s4353_s5 + $0x18] sm:$0xff] %v1282_v38 }
 0x3b8   : > { %v1483_v41 = vpop.f32.mrb[68].mxu0 }
 0x3b9   : > { %v1485_v43 = vpop.f32.mrb[69].mxu0  ;;  %v1642_v46 = vmax.f32 %v1483_v41, 0.0 }
 0x3ba   : > { %v1487_v45 = vpop.f32.mrb[70].mxu0  ;;  %v1643_v49 = vmax.f32 %v1485_v43, 0.0 }
 0x3bb   : > { %v1644_v47 = vmax.f32 %v1487_v45, 0.0  ;;  %v1489_v48 = vpop.f32.mrb[71].mxu0 }
 0x3bc   : > { %v1645_v50 = vmax.f32 %v1489_v48, 0.0 }
 0x3bd   : > { %v1706_v51 = vpack.c.bf16 %v1644_v47, %v1642_v46 }
 0x3be   : > { %v1707_v52 = vpack.c.bf16 %v1645_v50, %v1643_v49 }
 0x3c0   : > { %v1493_v53 = vpop.f32.mrb[72].mxu0  ;;  %1752 = vmatprep.subr.bf16.mxu1 %v1707_v52 }
 0x3c1   : > { %v1495_v54 = vpop.f32.mrb[73].mxu0  ;;  %1753 = vmatpush1.bf16.msra.mxu1 %v1706_v51  ;;  %v1646_v56 = vmax.f32 %v1493_v53, 0.0 }
 0x3c2   : > { %v1497_v55 = vpop.f32.mrb[74].mxu0  ;;  %v1647_v59 = vmax.f32 %v1495_v54, 0.0 }
 0x3c3   : > { %v1648_v57 = vmax.f32 %v1497_v55, 0.0  ;;  %v1499_v58 = vpop.f32.mrb[75].mxu0 }
 0x3c4   : > { %v1649_v60 = vmax.f32 %v1499_v58, 0.0 }
 0x3c5   : > { %v1708_v61 = vpack.c.bf16 %v1648_v57, %v1646_v56 }
 0x3c6   : > { %v1709_v62 = vpack.c.bf16 %v1649_v60, %v1647_v59 }
 0x3c8   : > { %v1503_v63 = vpop.f32.mrb[76].mxu0  ;;  %1754 = vmatprep.subr.bf16.mxu1 %v1709_v62 }
 0x3c9   : > { %v1505_v7 = vpop.f32.mrb[77].mxu0  ;;  %1755 = vmatpush1.bf16.msra.mxu1 %v1708_v61  ;;  %v1650_v9 = vmax.f32 %v1503_v63, 0.0 }
 0x3ca   : > { %v1507_v8 = vpop.f32.mrb[78].mxu0  ;;  %v1651_v12 = vmax.f32 %v1505_v7, 0.0 }
 0x3cb   : > { %v1652_v10 = vmax.f32 %v1507_v8, 0.0  ;;  %v1509_v11 = vpop.f32.mrb[79].mxu0 }
 0x3cc   : > { %v1653_v13 = vmax.f32 %v1509_v11, 0.0 }
 0x3cd   : > { %v1710_v14 = vpack.c.bf16 %v1652_v10, %v1650_v9 }
 0x3ce   : > { %v1711_v15 = vpack.c.bf16 %v1653_v13, %v1651_v12 }
 0x3d0   : > { %v1513_v16 = vpop.f32.mrb[80].mxu0  ;;  %1756 = vmatprep.subr.bf16.mxu1 %v1711_v15 }
 0x3d1   : > { %v1515_v17 = vpop.f32.mrb[81].mxu0  ;;  %1757 = vmatpush1.bf16.msra.mxu1 %v1710_v14  ;;  %v1654_v6 = vmax.f32 %v1513_v16, 0.0 }
 0x3d2   : > { %v1517_v4 = vpop.f32.mrb[82].mxu0  ;;  %v1655_v20 = vmax.f32 %v1515_v17, 0.0 }
 0x3d3   : > { %v1656_v24 = vmax.f32 %v1517_v4, 0.0  ;;  %v1519_v19 = vpop.f32.mrb[83].mxu0 }
 0x3d4   : > { %v1657_v21 = vmax.f32 %v1519_v19, 0.0 }
 0x3d5   : > { %v1712_v22 = vpack.c.bf16 %v1656_v24, %v1654_v6 }
 0x3d6   : > { %v1713_v23 = vpack.c.bf16 %v1657_v21, %v1655_v20 }
 0x3d8   : > { %v1523_v25 = vpop.f32.mrb[84].mxu0  ;;  %1758 = vmatprep.subr.bf16.mxu1 %v1713_v23 }
 0x3d9   : > { %v1525_v26 = vpop.f32.mrb[85].mxu0  ;;  %1759 = vmatpush1.bf16.msra.mxu1 %v1712_v22  ;;  %v1658_v28 = vmax.f32 %v1523_v25, 0.0 }
 0x3da   : > { %v1527_v27 = vpop.f32.mrb[86].mxu0  ;;  %v1659_v31 = vmax.f32 %v1525_v26, 0.0 }
 0x3db   : > { %v1660_v29 = vmax.f32 %v1527_v27, 0.0  ;;  %v1529_v30 = vpop.f32.mrb[87].mxu0 }
 0x3dc   : > { %v1661_v32 = vmax.f32 %v1529_v30, 0.0 }
 0x3dd   : > { %v1714_v33 = vpack.c.bf16 %v1660_v29, %v1658_v28 }
 0x3de   : > { %v1715_v34 = vpack.c.bf16 %v1661_v32, %v1659_v31 }
 0x3e0   : > { %v1533_v35 = vpop.f32.mrb[88].mxu0  ;;  %1760 = vmatprep.subr.bf16.mxu1 %v1715_v34 }
 0x3e1   : > { %v1535_v37 = vpop.f32.mrb[89].mxu0  ;;  %1761 = vmatpush1.bf16.msra.mxu1 %v1714_v33  ;;  %v1662_v39 = vmax.f32 %v1533_v35, 0.0 }
 0x3e2   : > { %v1537_v38 = vpop.f32.mrb[90].mxu0  ;;  %v1663_v43 = vmax.f32 %v1535_v37, 0.0 }
 0x3e3   : > { %v1664_v40 = vmax.f32 %v1537_v38, 0.0  ;;  %v1539_v41 = vpop.f32.mrb[91].mxu0 }
 0x3e4   : > { %v1665_v44 = vmax.f32 %v1539_v41, 0.0  ;;  %v1739_v41 = vld [vmem:[%s4855_s3 + $0x10] sm:$0xff] }
 0x3e5   : > { %v1716_v45 = vpack.c.bf16 %v1664_v40, %v1662_v39  ;;  %1742 = vperm.xlu1 %3930, %v1739_v41   ;;  %v4006_v41 = vld [vmem:[%s4853_s1 + $0x1e0] sm:$0xff]  }
 0x3e6   : > { %v1717_v46 = vpack.c.bf16 %v1665_v44, %v1663_v43 }
 0x3e8   : > { %v1543_v47 = vpop.f32.mrb[92].mxu0  ;;  %1762 = vmatprep.subr.bf16.mxu1 %v1717_v46 }
 0x3e9   : > { %v1545_v48 = vpop.f32.mrb[93].mxu0  ;;  %1763 = vmatpush1.bf16.msra.mxu1 %v1716_v45  ;;  %v1666_v50 = vmax.f32 %v1543_v47, 0.0 }
 0x3ea   : > { %v1547_v49 = vpop.f32.mrb[94].mxu0  ;;  %v1667_v53 = vmax.f32 %v1545_v48, 0.0 }
 0x3eb   : > { %v1668_v51 = vmax.f32 %v1547_v49, 0.0  ;;  %v1549_v52 = vpop.f32.mrb[95].mxu0 }
 0x3ec   : > { %v1669_v54 = vmax.f32 %v1549_v52, 0.0 }
 0x3ed   : > { %v1718_v55 = vpack.c.bf16 %v1668_v51, %v1666_v50 }
 0x3ee   : > { %v1719_v56 = vpack.c.bf16 %v1669_v54, %v1667_v53 }
 0x3f0   : > { %v1553_v57 = vpop.f32.mrb[96].mxu0  ;;  %1764 = vmatprep.subr.bf16.mxu1 %v1719_v56 }
 0x3f1   : > { %v1555_v58 = vpop.f32.mrb[97].mxu0  ;;  %1765 = vmatpush1.bf16.msra.mxu1 %v1718_v55  ;;  %v1670_v60 = vmax.f32 %v1553_v57, 0.0 }
 0x3f2   : > { %v1557_v59 = vpop.f32.mrb[98].mxu0  ;;  %v1671_v63 = vmax.f32 %v1555_v58, 0.0 }
 0x3f3   : > { %v1672_v61 = vmax.f32 %v1557_v59, 0.0  ;;  %v1559_v62 = vpop.f32.mrb[99].mxu0 }
 0x3f4   : > { %v1673_v7 = vmax.f32 %v1559_v62, 0.0 }
 0x3f5   : > { %v1720_v8 = vpack.c.bf16 %v1672_v61, %v1670_v60 }
 0x3f6   : > { %v1721_v9 = vpack.c.bf16 %v1673_v7, %v1671_v63 }
 0x3f8   : > { %v1563_v10 = vpop.f32.mrb[100].mxu0  ;;  %1766 = vmatprep.subr.bf16.mxu1 %v1721_v9 }
 0x3f9   : > { %v1565_v11 = vpop.f32.mrb[101].mxu0  ;;  %1767 = vmatpush1.bf16.msra.mxu1 %v1720_v8  ;;  %v1674_v13 = vmax.f32 %v1563_v10, 0.0 }
 0x3fa   : > { %v1567_v12 = vpop.f32.mrb[102].mxu0  ;;  %v1675_v16 = vmax.f32 %v1565_v11, 0.0 }
 0x3fb   : > { %v1676_v14 = vmax.f32 %v1567_v12, 0.0  ;;  %v1569_v15 = vpop.f32.mrb[103].mxu0 }
 0x3fc   : > { %v1677_v17 = vmax.f32 %v1569_v15, 0.0 }
 0x3fd   : > { %v1722_v4 = vpack.c.bf16 %v1676_v14, %v1674_v13 }
 0x3fe   : > { %v1723_v6 = vpack.c.bf16 %v1677_v17, %v1675_v16 }
 0x400   : > { %v1573_v24 = vpop.f32.mrb[104].mxu0  ;;  %1768 = vmatprep.subr.bf16.mxu1 %v1723_v6 }
 0x401   : > { %v1575_v19 = vpop.f32.mrb[105].mxu0  ;;  %1769 = vmatpush1.bf16.msra.mxu1 %v1722_v4  ;;  %v1678_v21 = vmax.f32 %v1573_v24, 0.0 }
 0x402   : > { %v1577_v20 = vpop.f32.mrb[106].mxu0  ;;  %v1679_v25 = vmax.f32 %v1575_v19, 0.0 }
 0x403   : > { %v1680_v22 = vmax.f32 %v1577_v20, 0.0  ;;  %v1579_v23 = vpop.f32.mrb[107].mxu0 }
 0x404   : > { %v1681_v26 = vmax.f32 %v1579_v23, 0.0 }
 0x405   : > { %v1724_v27 = vpack.c.bf16 %v1680_v22, %v1678_v21 }
 0x406   : > { %v1725_v28 = vpack.c.bf16 %v1681_v26, %v1679_v25 }
 0x408   : > { %v1583_v29 = vpop.f32.mrb[108].mxu0  ;;  %1770 = vmatprep.subr.bf16.mxu1 %v1725_v28 }
 0x409   : > { %v1585_v30 = vpop.f32.mrb[109].mxu0  ;;  %1771 = vmatpush1.bf16.msra.mxu1 %v1724_v27  ;;  %v1682_v32 = vmax.f32 %v1583_v29, 0.0 }
 0x40a   : > { %v1587_v31 = vpop.f32.mrb[110].mxu0  ;;  %v1683_v35 = vmax.f32 %v1585_v30, 0.0 }
 0x40b   : > { %v1684_v33 = vmax.f32 %v1587_v31, 0.0  ;;  %v1589_v34 = vpop.f32.mrb[111].mxu0 }
 0x40c   : > { %v1685_v37 = vmax.f32 %v1589_v34, 0.0  ;;  %v3694_v34 = vcombine.low %v4478_v42, %v4478_v42  ;;  %v4001_v42 = vld [vmem:[%s4853_s1 + $0x1b8] sm:$0xff]  }
 0x40d   : > { %v1726_v38 = vpack.c.bf16 %v1684_v33, %v1682_v32 }
 0x40e   : > { %v1727_v39 = vpack.c.bf16 %v1685_v37, %v1683_v35  ;;  %v3994_v35 = vld [vmem:[%s4853_s1 + $0x180] sm:$0xff]  }
 0x40f   : > { %v4002_v37 = vld [vmem:[%s4853_s1 + $0x1c0] sm:$0xff]  }
 0x410   : > { %v1593_v40 = vpop.f32.mrb[112].mxu0  ;;  %1772 = vmatprep.subr.bf16.mxu1 %v1727_v39  ;;  %v4004_v39 = vld [vmem:[%s4853_s1 + $0x1d0] sm:$0xff]  }
 0x411   : > { %v1595_v43 = vpop.f32.mrb[113].mxu0  ;;  %1773 = vmatpush1.bf16.msra.mxu1 %v1726_v38  ;;  %v1686_v45 = vmax.f32 %v1593_v40, 0.0  ;;  %v4003_v38 = vld [vmem:[%s4853_s1 + $0x1c8] sm:$0xff]   ;;  %v4005_v40 = vld [vmem:[%s4853_s1 + $0x1d8] sm:$0xff]  }
 0x412   : > { %v1597_v44 = vpop.f32.mrb[114].mxu0  ;;  %v1687_v48 = vmax.f32 %v1595_v43, 0.0  ;;  %v4007_v43 = vld [vmem:[%s4853_s1 + $0x1e8] sm:$0xff]  }
 0x413   : > { %v1688_v46 = vmax.f32 %v1597_v44, 0.0  ;;  %v1599_v47 = vpop.f32.mrb[115].mxu0  ;;  %v4008_v44 = vld [vmem:[%s4853_s1 + $0x1f0] sm:$0xff]  }
 0x414   : > { %v1689_v49 = vmax.f32 %v1599_v47, 0.0 }
 0x415   : > { %v1728_v50 = vpack.c.bf16 %v1688_v46, %v1686_v45  ;;  %v4009_v45 = vld [vmem:[%s4853_s1 + $0x1f8] sm:$0xff]  }
 0x416   : > { %v1729_v51 = vpack.c.bf16 %v1689_v49, %v1687_v48 }
 0x418   : > { %v1603_v52 = vpop.f32.mrb[116].mxu0  ;;  %1774 = vmatprep.subr.bf16.mxu1 %v1729_v51 }
 0x419   : > { %v1605_v53 = vpop.f32.mrb[117].mxu0  ;;  %1775 = vmatpush1.bf16.msra.mxu1 %v1728_v50  ;;  %v1690_v55 = vmax.f32 %v1603_v52, 0.0 }
 0x41a   : > { %v1607_v54 = vpop.f32.mrb[118].mxu0  ;;  %v1691_v58 = vmax.f32 %v1605_v53, 0.0 }
 0x41b   : > { %v1692_v56 = vmax.f32 %v1607_v54, 0.0  ;;  %v1609_v57 = vpop.f32.mrb[119].mxu0 }
 0x41c   : > { %v1693_v59 = vmax.f32 %v1609_v57, 0.0 }
 0x41d   : > { %v1730_v60 = vpack.c.bf16 %v1692_v56, %v1690_v55  ;;  %v4012_v55 = vld [vmem:[%s4854_s2 + $0x1c] ss:$8 sps:$4 sm:$0xff]  }
 0x41e   : > { %v1731_v61 = vpack.c.bf16 %v1693_v59, %v1691_v58  ;;  %2315 = vmatprep.mubr.bf16.mxu0 %v4012_v55 }
 0x420   : > { %v1613_v62 = vpop.f32.mrb[120].mxu0  ;;  %1776 = vmatprep.subr.bf16.mxu1 %v1731_v61 }
 0x421   : > { %v1615_v63 = vpop.f32.mrb[121].mxu0  ;;  %1777 = vmatpush1.bf16.msra.mxu1 %v1730_v60  ;;  %v1694_v8 = vmax.f32 %v1613_v62, 0.0 }
 0x422   : > { %v1617_v7 = vpop.f32.mrb[122].mxu0  ;;  %v1695_v11 = vmax.f32 %v1615_v63, 0.0 }
 0x423   : > { %v1696_v9 = vmax.f32 %v1617_v7, 0.0  ;;  %v1619_v10 = vpop.f32.mrb[123].mxu0 }
 0x424   : > { %v1697_v12 = vmax.f32 %v1619_v10, 0.0 }
 0x425   : > { %v1732_v13 = vpack.c.bf16 %v1696_v9, %v1694_v8 }
 0x426   : > { %v1733_v14 = vpack.c.bf16 %v1697_v12, %v1695_v11 }
 0x428   : > { %v1623_v15 = vpop.f32.mrb[124].mxu0  ;;  %1778 = vmatprep.subr.bf16.mxu1 %v1733_v14 }
 0x429   : > { %v1625_v16 = vpop.f32.mrb[125].mxu0  ;;  %1779 = vmatpush1.bf16.msra.mxu1 %v1732_v13  ;;  %v1698_v4 = vmax.f32 %v1623_v15, 0.0 }
 0x42a   : > { %v1627_v17 = vpop.f32.mrb[126].mxu0  ;;  %v1699_v19 = vmax.f32 %v1625_v16, 0.0 }
 0x42b   : > { %v1700_v6 = vmax.f32 %v1627_v17, 0.0  ;;  %v1629_v24 = vpop.f32.mrb[127].mxu0 }
 0x42c   : > { %v1701_v20 = vmax.f32 %v1629_v24, 0.0 }
 0x42d   : > { %v1734_v21 = vpack.c.bf16 %v1700_v6, %v1698_v4 }
 0x42e   : > { %v1735_v22 = vpack.c.bf16 %v1701_v20, %v1699_v19 }
 0x430   : > { %v1633_v23 = vpop.f32.mrb[128].mxu0  ;;  %1780 = vmatprep.subr.bf16.mxu1 %v1735_v22 }
 0x431   : > { %v1635_v25 = vpop.f32.mrb[129].mxu0  ;;  %1781 = vmatpush1.bf16.msra.mxu1 %v1734_v21  ;;  %v1702_v27 = vmax.f32 %v1633_v23, 0.0 }
 0x432   : > { %v1637_v26 = vpop.f32.mrb[130].mxu0  ;;  %v1703_v30 = vmax.f32 %v1635_v25, 0.0 }
 0x433   : > { %v1704_v28 = vmax.f32 %v1637_v26, 0.0  ;;  %v1639_v29 = vpop.f32.mrb[131].mxu0 }
 0x434   : > { %v1705_v31 = vmax.f32 %v1639_v29, 0.0 }
 0x435   : > { %v1736_v32 = vpack.c.bf16 %v1704_v28, %v1702_v27 }
 0x436   : > { %v1737_v33 = vpack.c.bf16 %v1705_v31, %v1703_v30 }
 0x438   : > { %1782 = vmatprep.subr.bf16.mxu1 %v1737_v33 }
 0x439   : > { %1783 = vmatpush1.bf16.msra.mxu1 %v1736_v32 }
 0x43a   : > { %1956 = vmatprep.subr.bf16.mxu1 %v4370_v18  ;;  %v3995_v18 = vld [vmem:[%s4853_s1 + $0x188] sm:$0xff]  }
 0x43c   : > { %1785 = vmatmul.mubr.bf16.vlgmr.msra.gmra.mrb[68].mxu1 %v3694_v34 }
 0x43d   : > { %1957 = vmatpush1.bf16.msra.mxu1 %v4374_v1  ;;  %1988 = vmatprep.mubr.bf16.mxu1 %v4093_v0  ;;  %v3996_v1 = vld [vmem:[%s4853_s1 + $0x190] sm:$0xff]  }
 0x43e   : > { %1958 = vmatprep.subr.bf16.mxu1 %v4379_v2  ;;  %v3997_v2 = vld [vmem:[%s4853_s1 + $0x198] sm:$0xff]  }
 0x441   : > { %1959 = vmatpush1.bf16.msra.mxu1 %v4383_v3  ;;  %v3998_v3 = vld [vmem:[%s4853_s1 + $0x1a0] sm:$0xff]  }
 0x442   : > { %1960 = vmatprep.subr.bf16.mxu1 %v4387_v36  ;;  %v3999_v36 = vld [vmem:[%s4853_s1 + $0x1a8] sm:$0xff]  }
 0x445   : > { %1961 = vmatpush1.bf16.msra.mxu1 %v4394_v5  ;;  %v4000_v5 = vld [vmem:[%s4853_s1 + $0x1b0] sm:$0xff]  }
 0x448   : > { %3744 = vmatmul.mubr.msk.bf16.vlgmr.msra.gmra.mrb[72].mxu1 %vm386_vm0, %v3994_v35 }
 0x449   : > { %1998 = vmatprep.mubr.bf16.mxu1 %v4093_v0 }
 0x450   : > { %3745 = vmatmul.mubr.msk.bf16.gmra.mrb[76].mxu1 %vm386_vm0, %v3995_v18 }
 0x451   : > { %2008 = vmatprep.mubr.bf16.mxu1 %v4093_v0 }
 0x458   : > { %3746 = vmatmul.mubr.msk.bf16.gmra.mrb[80].mxu1 %vm386_vm0, %v3996_v1 }
 0x459   : > { %2018 = vmatprep.mubr.bf16.mxu1 %v4093_v0 }
 0x460   : > { %3747 = vmatmul.mubr.msk.bf16.gmra.mrb[84].mxu1 %vm386_vm0, %v3997_v2 }
 0x461   : > { %2028 = vmatprep.mubr.bf16.mxu1 %v4093_v0 }
 0x464   : > { %v1743_v46 = vpop.permute.xlu1 %1742 }
 0x468   : > { %3748 = vmatmul.mubr.msk.bf16.gmra.mrb[88].mxu1 %vm386_vm0, %v3998_v3 }
 0x469   : > { %2038 = vmatprep.mubr.bf16.mxu1 %v4093_v0 }
 0x470   : > { %3749 = vmatmul.mubr.msk.bf16.gmra.mrb[92].mxu1 %vm386_vm0, %v3999_v36 }
 0x471   : > { %2048 = vmatprep.mubr.bf16.mxu1 %v4093_v0 }
 0x478   : > { %3750 = vmatmul.mubr.msk.bf16.gmra.mrb[96].mxu1 %vm386_vm0, %v4000_v5 }
 0x479   : > { %2058 = vmatprep.mubr.bf16.mxu1 %v4093_v0 }
 0x480   : > { %3751 = vmatmul.mubr.msk.bf16.gmra.mrb[100].mxu1 %vm386_vm0, %v4001_v42 }
 0x481   : > { %2068 = vmatprep.mubr.bf16.mxu1 %v4093_v0 }
 0x488   : > { %3752 = vmatmul.mubr.msk.bf16.gmra.mrb[104].mxu1 %vm386_vm0, %v4002_v37 }
 0x489   : > { %2078 = vmatprep.mubr.bf16.mxu1 %v4093_v0 }
 0x490   : > { %3753 = vmatmul.mubr.msk.bf16.gmra.mrb[108].mxu1 %vm386_vm0, %v4003_v38 }
 0x491   : > { %2088 = vmatprep.mubr.bf16.mxu1 %v4093_v0 }
 0x498   : > { %3754 = vmatmul.mubr.msk.bf16.gmra.mrb[112].mxu1 %vm386_vm0, %v4004_v39 }
 0x499   : > { %2098 = vmatprep.mubr.bf16.mxu1 %v4093_v0 }
 0x4a0   : > { %3755 = vmatmul.mubr.msk.bf16.gmra.mrb[116].mxu1 %vm386_vm0, %v4005_v40 }
 0x4a1   : > { %2108 = vmatprep.mubr.bf16.mxu1 %v4093_v0 }
 0x4a8   : > { %3756 = vmatmul.mubr.msk.bf16.gmra.mrb[120].mxu1 %vm386_vm0, %v4006_v41 }
 0x4a9   : > { %2118 = vmatprep.mubr.bf16.mxu1 %v4093_v0 }
 0x4b0   : > { %3757 = vmatmul.mubr.msk.bf16.gmra.mrb[124].mxu1 %vm386_vm0, %v4007_v43 }
 0x4b1   : > { %2128 = vmatprep.mubr.bf16.mxu1 %v4093_v0 }
 0x4b8   : > { %3758 = vmatmul.mubr.msk.bf16.gmra.mrb[128].mxu1 %vm386_vm0, %v4008_v44 }
 0x4b9   : > { %2138 = vmatprep.mubr.bf16.mxu1 %v4093_v0 }
 0x4c0   : > { %3759 = vmatmul.mubr.msk.bf16.gmra.mrb[132].mxu1 %vm386_vm0, %v4009_v45 }
 0x50f   : > { %v1786_v47 = vpop.f32.mrb[68].mxu1 }
 0x510   : > { %v1787_v48 = vadd.f32 %v1786_v47, %v1743_v46  ;;  %v1788_v49 = vpop.f32.mrb[69].mxu1 }
 0x511   : > { %v1789_v50 = vadd.f32 %v1788_v49, %v1743_v46  ;;  %v1790_v51 = vpop.f32.mrb[70].mxu1 }
 0x512   : > { %1793 = vst [vmem:[%s4353_s5 + $0x20] sm:$0xff] %v1787_v48  ;;  %v1791_v52 = vpop.f32.mrb[71].mxu1 }
 0x513   : > { %1794 = vst [vmem:[%s4353_s5 + $0x28] sm:$0xff] %v1789_v50 }
 0x51b   : > { %v1990_v53 = vpop.f32.mrb[72].mxu1 }
 0x51c   : > { %v1992_v54 = vpop.f32.mrb[73].mxu1  ;;  %v2149_v57 = vmax.f32 %v1990_v53, 0.0 }
 0x51d   : > { %v1994_v56 = vpop.f32.mrb[74].mxu1  ;;  %v2150_v60 = vmax.f32 %v1992_v54, 0.0 }
 0x51e   : > { %v2151_v58 = vmax.f32 %v1994_v56, 0.0  ;;  %v1996_v59 = vpop.f32.mrb[75].mxu1 }
 0x51f   : > { %v2152_v61 = vmax.f32 %v1996_v59, 0.0 }
 0x520   : > { %v2213_v62 = vpack.c.bf16 %v2151_v58, %v2149_v57 }
 0x521   : > { %v2214_v63 = vpack.c.bf16 %v2152_v61, %v2150_v60 }
 0x523   : > { %v2000_v7 = vpop.f32.mrb[76].mxu1  ;;  %2283 = vmatprep.subr.bf16.mxu0 %v2214_v63 }
 0x524   : > { %v2002_v8 = vpop.f32.mrb[77].mxu1  ;;  %2284 = vmatpush1.bf16.msra.mxu0 %v2213_v62  ;;  %v2153_v10 = vmax.f32 %v2000_v7, 0.0 }
 0x525   : > { %v2004_v9 = vpop.f32.mrb[78].mxu1  ;;  %v2154_v13 = vmax.f32 %v2002_v8, 0.0 }
 0x526   : > { %v2155_v11 = vmax.f32 %v2004_v9, 0.0  ;;  %v2006_v12 = vpop.f32.mrb[79].mxu1 }
 0x527   : > { %v2156_v14 = vmax.f32 %v2006_v12, 0.0 }
 0x528   : > { %v2215_v15 = vpack.c.bf16 %v2155_v11, %v2153_v10 }
 0x529   : > { %v2216_v16 = vpack.c.bf16 %v2156_v14, %v2154_v13 }
 0x52b   : > { %v2010_v17 = vpop.f32.mrb[80].mxu1  ;;  %2285 = vmatprep.subr.bf16.mxu0 %v2216_v16 }
 0x52c   : > { %v2012_v4 = vpop.f32.mrb[81].mxu1  ;;  %2286 = vmatpush1.bf16.msra.mxu0 %v2215_v15  ;;  %v2157_v24 = vmax.f32 %v2010_v17, 0.0 }
 0x52d   : > { %v2014_v6 = vpop.f32.mrb[82].mxu1  ;;  %v2158_v21 = vmax.f32 %v2012_v4, 0.0 }
 0x52e   : > { %v2159_v19 = vmax.f32 %v2014_v6, 0.0  ;;  %v2016_v20 = vpop.f32.mrb[83].mxu1 }
 0x52f   : > { %v2160_v22 = vmax.f32 %v2016_v20, 0.0 }
 0x530   : > { %v2217_v23 = vpack.c.bf16 %v2159_v19, %v2157_v24 }
 0x531   : > { %v2218_v25 = vpack.c.bf16 %v2160_v22, %v2158_v21 }
 0x533   : > { %v2020_v26 = vpop.f32.mrb[84].mxu1  ;;  %2287 = vmatprep.subr.bf16.mxu0 %v2218_v25 }
 0x534   : > { %v2022_v27 = vpop.f32.mrb[85].mxu1  ;;  %2288 = vmatpush1.bf16.msra.mxu0 %v2217_v23  ;;  %v2161_v29 = vmax.f32 %v2020_v26, 0.0 }
 0x535   : > { %v2024_v28 = vpop.f32.mrb[86].mxu1  ;;  %v2162_v32 = vmax.f32 %v2022_v27, 0.0 }
 0x536   : > { %v2163_v30 = vmax.f32 %v2024_v28, 0.0  ;;  %v2026_v31 = vpop.f32.mrb[87].mxu1 }
 0x537   : > { %v2164_v33 = vmax.f32 %v2026_v31, 0.0 }
 0x538   : > { %v2219_v34 = vpack.c.bf16 %v2163_v30, %v2161_v29 }
 0x539   : > { %v2220_v35 = vpack.c.bf16 %v2164_v33, %v2162_v32 }
 0x53b   : > { %v2030_v18 = vpop.f32.mrb[88].mxu1  ;;  %2289 = vmatprep.subr.bf16.mxu0 %v2220_v35 }
 0x53c   : > { %v2032_v1 = vpop.f32.mrb[89].mxu1  ;;  %2290 = vmatpush1.bf16.msra.mxu0 %v2219_v34  ;;  %v2165_v3 = vmax.f32 %v2030_v18, 0.0 }
 0x53d   : > { %v2034_v2 = vpop.f32.mrb[90].mxu1  ;;  %v2166_v42 = vmax.f32 %v2032_v1, 0.0 }
 0x53e   : > { %v2167_v36 = vmax.f32 %v2034_v2, 0.0  ;;  %v2036_v5 = vpop.f32.mrb[91].mxu1 }
 0x53f   : > { %v2168_v37 = vmax.f32 %v2036_v5, 0.0  ;;  %v2248_v5 = vld [vmem:[%s4855_s3 + $0x18] sm:$0xff] }
 0x540   : > { %v2221_v38 = vpack.c.bf16 %v2167_v36, %v2165_v3  ;;  %2253 = vperm.xlu1 %3930, %v2248_v5   ;;  %v4610_v5 = vld [vmem:[%s4146_s22 + $0x24] ss:$8 sps:$4 sm:$0xff]  }
 0x541   : > { %v2222_v39 = vpack.c.bf16 %v2168_v37, %v2166_v42  ;;  %v2249_v42 = vld [vmem:[%s4855_s3 + $0x20] sm:$0xff] }
 0x542   : > { %2258 = vperm.xlu0 %3929, %v2249_v42   ;;  %v4614_v42 = vld [vmem:[%s4146_s22 + $0x20] ss:$8 sps:$4 sm:$0xff]  }
 0x543   : > { %v2040_v40 = vpop.f32.mrb[92].mxu1  ;;  %2291 = vmatprep.subr.bf16.mxu0 %v2222_v39 }
 0x544   : > { %v2042_v41 = vpop.f32.mrb[93].mxu1  ;;  %2292 = vmatpush1.bf16.msra.mxu0 %v2221_v38  ;;  %v2169_v44 = vmax.f32 %v2040_v40, 0.0 }
 0x545   : > { %v2044_v43 = vpop.f32.mrb[94].mxu1  ;;  %v2170_v47 = vmax.f32 %v2042_v41, 0.0 }
 0x546   : > { %v2171_v45 = vmax.f32 %v2044_v43, 0.0  ;;  %v2046_v46 = vpop.f32.mrb[95].mxu1 }
 0x547   : > { %v2172_v48 = vmax.f32 %v2046_v46, 0.0 }
 0x548   : > { %v2223_v49 = vpack.c.bf16 %v2171_v45, %v2169_v44 }
 0x549   : > { %v2224_v50 = vpack.c.bf16 %v2172_v48, %v2170_v47  ;;  %v2250_v48 = vld [vmem:[%s4855_s3 + $0x28] sm:$0xff] }
 0x54a   : > { %2263 = vperm.xlu1 %3930, %v2250_v48   ;;  %v4025_v48 = vld [vmem:[%s4853_s1 + $0x250] sm:$0xff]  }
 0x54b   : > { %v2050_v51 = vpop.f32.mrb[96].mxu1  ;;  %2293 = vmatprep.subr.bf16.mxu0 %v2224_v50 }
 0x54c   : > { %v2052_v52 = vpop.f32.mrb[97].mxu1  ;;  %2294 = vmatpush1.bf16.msra.mxu0 %v2223_v49  ;;  %v2173_v54 = vmax.f32 %v2050_v51, 0.0 }
 0x54d   : > { %v2054_v53 = vpop.f32.mrb[98].mxu1  ;;  %v2174_v57 = vmax.f32 %v2052_v52, 0.0 }
 0x54e   : > { %v2175_v55 = vmax.f32 %v2054_v53, 0.0  ;;  %v2056_v56 = vpop.f32.mrb[99].mxu1 }
 0x54f   : > { %v2176_v58 = vmax.f32 %v2056_v56, 0.0 }
 0x550   : > { %v2225_v59 = vpack.c.bf16 %v2175_v55, %v2173_v54 }
 0x551   : > { %v2226_v60 = vpack.c.bf16 %v2176_v58, %v2174_v57 }
 0x553   : > { %v2060_v61 = vpop.f32.mrb[100].mxu1  ;;  %2295 = vmatprep.subr.bf16.mxu0 %v2226_v60 }
 0x554   : > { %v2062_v62 = vpop.f32.mrb[101].mxu1  ;;  %2296 = vmatpush1.bf16.msra.mxu0 %v2225_v59  ;;  %v2177_v7 = vmax.f32 %v2060_v61, 0.0 }
 0x555   : > { %v2064_v63 = vpop.f32.mrb[102].mxu1  ;;  %v2178_v10 = vmax.f32 %v2062_v62, 0.0 }
 0x556   : > { %v2179_v8 = vmax.f32 %v2064_v63, 0.0  ;;  %v2066_v9 = vpop.f32.mrb[103].mxu1 }
 0x557   : > { %v2180_v11 = vmax.f32 %v2066_v9, 0.0 }
 0x558   : > { %v2227_v12 = vpack.c.bf16 %v2179_v8, %v2177_v7 }
 0x559   : > { %v2228_v13 = vpack.c.bf16 %v2180_v11, %v2178_v10 }
 0x55b   : > { %v2070_v14 = vpop.f32.mrb[104].mxu1  ;;  %2297 = vmatprep.subr.bf16.mxu0 %v2228_v13 }
 0x55c   : > { %v2072_v15 = vpop.f32.mrb[105].mxu1  ;;  %2298 = vmatpush1.bf16.msra.mxu0 %v2227_v12  ;;  %v2181_v17 = vmax.f32 %v2070_v14, 0.0 }
 0x55d   : > { %v2074_v16 = vpop.f32.mrb[106].mxu1  ;;  %v2182_v24 = vmax.f32 %v2072_v15, 0.0 }
 0x55e   : > { %v2183_v4 = vmax.f32 %v2074_v16, 0.0  ;;  %v2076_v6 = vpop.f32.mrb[107].mxu1 }
 0x55f   : > { %v2184_v19 = vmax.f32 %v2076_v6, 0.0 }
 0x560   : > { %v2229_v20 = vpack.c.bf16 %v2183_v4, %v2181_v17 }
 0x561   : > { %v2230_v21 = vpack.c.bf16 %v2184_v19, %v2182_v24 }
 0x563   : > { %v2080_v22 = vpop.f32.mrb[108].mxu1  ;;  %2299 = vmatprep.subr.bf16.mxu0 %v2230_v21 }
 0x564   : > { %v2082_v23 = vpop.f32.mrb[109].mxu1  ;;  %2300 = vmatpush1.bf16.msra.mxu0 %v2229_v20  ;;  %v2185_v26 = vmax.f32 %v2080_v22, 0.0 }
 0x565   : > { %v2084_v25 = vpop.f32.mrb[110].mxu1  ;;  %v2186_v29 = vmax.f32 %v2082_v23, 0.0 }
 0x566   : > { %v2187_v27 = vmax.f32 %v2084_v25, 0.0  ;;  %v2086_v28 = vpop.f32.mrb[111].mxu1 }
 0x567   : > { %v2188_v30 = vmax.f32 %v2086_v28, 0.0 }
 0x568   : > { %v2231_v31 = vpack.c.bf16 %v2187_v27, %v2185_v26 }
 0x569   : > { %v2232_v32 = vpack.c.bf16 %v2188_v30, %v2186_v29 }
 0x56b   : > { %v2090_v33 = vpop.f32.mrb[112].mxu1  ;;  %2301 = vmatprep.subr.bf16.mxu0 %v2232_v32 }
 0x56c   : > { %v2092_v34 = vpop.f32.mrb[113].mxu1  ;;  %2302 = vmatpush1.bf16.msra.mxu0 %v2231_v31  ;;  %v2189_v18 = vmax.f32 %v2090_v33, 0.0  ;;  %v2247_v33 = vld [vmem:[%s4854_s2 + $0x28] sm:$0xff] }
 0x56d   : > { %v2094_v35 = vpop.f32.mrb[114].mxu1  ;;  %v2190_v3 = vmax.f32 %v2092_v34, 0.0  ;;  %v4010_v34 = vld [vmem:[%s4854_s2 + $0x18] ss:$8 sps:$4 sm:$0xff]  }
 0x56e   : > { %v2191_v1 = vmax.f32 %v2094_v35, 0.0  ;;  %v2096_v2 = vpop.f32.mrb[115].mxu1  ;;  %v3763_v35 = vcombine.high %v2247_v33, %v2247_v33 }
 0x56f   : > { %v2192_v36 = vmax.f32 %v2096_v2, 0.0  ;;  %v4602_v2 = vld [vmem:[%s4146_s22 + $0x14] ss:$8 sps:$4 sm:$0xff]  }
 0x570   : > { %v2233_v37 = vpack.c.bf16 %v2191_v1, %v2189_v18  ;;  %v4594_v18 = vld [vmem:[%s4146_s22 + $0x4] ss:$8 sps:$4 sm:$0xff]   ;;  %v4598_v1 = vld [vmem:[%s4146_s22] ss:$8 sps:$4 sm:$0xff]  }
 0x571   : > { %v2234_v38 = vpack.c.bf16 %v2192_v36, %v2190_v3  ;;  %v3762_v3 = vcombine.low %v2247_v33, %v2247_v33  ;;  %v4606_v36 = vld [vmem:[%s4146_s22 + $0x10] ss:$8 sps:$4 sm:$0xff]  }
 0x573   : > { %v2100_v39 = vpop.f32.mrb[116].mxu1  ;;  %2303 = vmatprep.subr.bf16.mxu0 %v2234_v38  ;;  %v4016_v38 = vld [vmem:[%s4853_s1 + $0x208] sm:$0xff]  }
 0x574   : > { %v2102_v40 = vpop.f32.mrb[117].mxu1  ;;  %2304 = vmatpush1.bf16.msra.mxu0 %v2233_v37  ;;  %v2193_v43 = vmax.f32 %v2100_v39, 0.0  ;;  %v4015_v37 = vld [vmem:[%s4853_s1 + $0x200] sm:$0xff]   ;;  %v4017_v39 = vld [vmem:[%s4853_s1 + $0x210] sm:$0xff]  }
 0x575   : > { %v2104_v41 = vpop.f32.mrb[118].mxu1  ;;  %v2194_v46 = vmax.f32 %v2102_v40, 0.0  ;;  %v4018_v40 = vld [vmem:[%s4853_s1 + $0x218] sm:$0xff]  }
 0x576   : > { %v2195_v44 = vmax.f32 %v2104_v41, 0.0  ;;  %v2106_v45 = vpop.f32.mrb[119].mxu1  ;;  %v4019_v41 = vld [vmem:[%s4853_s1 + $0x220] sm:$0xff]  }
 0x577   : > { %v2196_v47 = vmax.f32 %v2106_v45, 0.0  ;;  %v4022_v45 = vld [vmem:[%s4853_s1 + $0x238] sm:$0xff]  }
 0x578   : > { %v2235_v49 = vpack.c.bf16 %v2195_v44, %v2193_v43  ;;  %v4020_v43 = vld [vmem:[%s4853_s1 + $0x228] sm:$0xff]   ;;  %v4021_v44 = vld [vmem:[%s4853_s1 + $0x230] sm:$0xff]  }
 0x579   : > { %v2236_v50 = vpack.c.bf16 %v2196_v47, %v2194_v46  ;;  %v4023_v46 = vld [vmem:[%s4853_s1 + $0x240] sm:$0xff]   ;;  %v4024_v47 = vld [vmem:[%s4853_s1 + $0x248] sm:$0xff]  }
 0x57b   : > { %v2110_v51 = vpop.f32.mrb[120].mxu1  ;;  %2305 = vmatprep.subr.bf16.mxu0 %v2236_v50  ;;  %v4027_v50 = vld [vmem:[%s4853_s1 + $0x260] sm:$0xff]  }
 0x57c   : > { %v2112_v52 = vpop.f32.mrb[121].mxu1  ;;  %2306 = vmatpush1.bf16.msra.mxu0 %v2235_v49  ;;  %v2197_v54 = vmax.f32 %v2110_v51, 0.0  ;;  %v4026_v49 = vld [vmem:[%s4853_s1 + $0x258] sm:$0xff]   ;;  %v4028_v51 = vld [vmem:[%s4853_s1 + $0x268] sm:$0xff]  }
 0x57d   : > { %v2114_v53 = vpop.f32.mrb[122].mxu1  ;;  %v2198_v57 = vmax.f32 %v2112_v52, 0.0  ;;  %v4029_v52 = vld [vmem:[%s4853_s1 + $0x270] sm:$0xff]  }
 0x57e   : > { %v2199_v55 = vmax.f32 %v2114_v53, 0.0  ;;  %v2116_v56 = vpop.f32.mrb[123].mxu1  ;;  %v4030_v53 = vld [vmem:[%s4853_s1 + $0x278] sm:$0xff]  }
 0x57f   : > { %v2200_v58 = vmax.f32 %v2116_v56, 0.0 }
 0x580   : > { %v2237_v59 = vpack.c.bf16 %v2199_v55, %v2197_v54 }
 0x581   : > { %v2238_v60 = vpack.c.bf16 %v2200_v58, %v2198_v57 }
 0x583   : > { %v2120_v61 = vpop.f32.mrb[124].mxu1  ;;  %2307 = vmatprep.subr.bf16.mxu0 %v2238_v60 }
 0x584   : > { %v2122_v62 = vpop.f32.mrb[125].mxu1  ;;  %2308 = vmatpush1.bf16.msra.mxu0 %v2237_v59  ;;  %v2201_v7 = vmax.f32 %v2120_v61, 0.0 }
 0x585   : > { %v2124_v63 = vpop.f32.mrb[126].mxu1  ;;  %v2202_v10 = vmax.f32 %v2122_v62, 0.0 }
 0x586   : > { %v2203_v8 = vmax.f32 %v2124_v63, 0.0  ;;  %v2126_v9 = vpop.f32.mrb[127].mxu1 }
 0x587   : > { %v2204_v11 = vmax.f32 %v2126_v9, 0.0 }
 0x588   : > { %v2239_v12 = vpack.c.bf16 %v2203_v8, %v2201_v7 }
 0x589   : > { %v2240_v13 = vpack.c.bf16 %v2204_v11, %v2202_v10 }
 0x58b   : > { %v2130_v14 = vpop.f32.mrb[128].mxu1  ;;  %2309 = vmatprep.subr.bf16.mxu0 %v2240_v13 }
 0x58c   : > { %v2132_v15 = vpop.f32.mrb[129].mxu1  ;;  %2310 = vmatpush1.bf16.msra.mxu0 %v2239_v12  ;;  %v2205_v17 = vmax.f32 %v2130_v14, 0.0 }
 0x58d   : > { %v2134_v16 = vpop.f32.mrb[130].mxu1  ;;  %v2206_v24 = vmax.f32 %v2132_v15, 0.0  ;;  %v4706_v15 = vld [vmem:[%s4854_s2 + $0x30] sm:$0xff] }
 0x58e   : > { %v2207_v4 = vmax.f32 %v2134_v16, 0.0  ;;  %v2136_v6 = vpop.f32.mrb[131].mxu1 }
 0x58f   : > { %v2208_v19 = vmax.f32 %v2136_v6, 0.0 }
 0x590   : > { %v2241_v20 = vpack.c.bf16 %v2207_v4, %v2205_v17  ;;  %v3829_v17 = vcombine.high %v4706_v15, %v4706_v15 }
 0x591   : > { %v2242_v21 = vpack.c.bf16 %v2208_v19, %v2206_v24 }
 0x592   : > { %2836 = vmatprep.mubr.bf16.mxu1 %v3829_v17 }
 0x593   : > { %v2140_v22 = vpop.f32.mrb[132].mxu1  ;;  %2311 = vmatprep.subr.bf16.mxu0 %v2242_v21 }
 0x594   : > { %v2142_v23 = vpop.f32.mrb[133].mxu1  ;;  %2312 = vmatpush1.bf16.msra.mxu0 %v2241_v20  ;;  %v2209_v26 = vmax.f32 %v2140_v22, 0.0 }
 0x595   : > { %v2144_v25 = vpop.f32.mrb[134].mxu1  ;;  %v2210_v29 = vmax.f32 %v2142_v23, 0.0 }
 0x596   : > { %v2211_v27 = vmax.f32 %v2144_v25, 0.0  ;;  %v2146_v28 = vpop.f32.mrb[135].mxu1 }
 0x597   : > { %v2212_v30 = vmax.f32 %v2146_v28, 0.0 }
 0x598   : > { %v2243_v31 = vpack.c.bf16 %v2211_v27, %v2209_v26 }
 0x599   : > { %v2244_v32 = vpack.c.bf16 %v2212_v30, %v2210_v29 }
 0x59b   : > { %2313 = vmatprep.subr.bf16.mxu0 %v2244_v32 }
 0x59c   : > { %2314 = vmatpush1.bf16.msra.mxu0 %v2243_v31 }
 0x59d   : > { %2501 = vmatprep.subr.bf16.mxu0 %v4594_v18 }
 0x59f   : > { %2316 = vmatmul.mubr.bf16.vlgmr.msra.gmra.mrb[132].mxu0 %v4010_v34 }
 0x5a0   : > { %2502 = vmatpush1.bf16.msra.mxu0 %v4598_v1  ;;  %2325 = vmatprep.mubr.bf16.mxu0 %v3763_v35 }
 0x5a1   : > { %2503 = vmatprep.subr.bf16.mxu0 %v4602_v2 }
 0x5a4   : > { %2504 = vmatpush1.bf16.msra.mxu0 %v4606_v36 }
 0x5a5   : > { %2505 = vmatprep.subr.bf16.mxu0 %v4610_v5 }
 0x5a7   : > { %2326 = vmatmul.mubr.bf16.gmra.mrb[136].mxu0 %v3762_v3 }
 0x5a8   : > { %2506 = vmatpush1.bf16.msra.mxu0 %v4614_v42  ;;  %2533 = vmatprep.mubr.bf16.mxu0 %v4093_v0 }
 0x5af   : > { %3812 = vmatmul.mubr.msk.bf16.vlgmr.msra.gmra.mrb[140].mxu0 %vm386_vm0, %v4015_v37 }
 0x5b0   : > { %2543 = vmatprep.mubr.bf16.mxu0 %v4093_v0 }
 0x5b7   : > { %3813 = vmatmul.mubr.msk.bf16.gmra.mrb[144].mxu0 %vm386_vm0, %v4016_v38 }
 0x5b8   : > { %2553 = vmatprep.mubr.bf16.mxu0 %v4093_v0 }
 0x5bf   : > { %3814 = vmatmul.mubr.msk.bf16.gmra.mrb[148].mxu0 %vm386_vm0, %v4017_v39  ;;  %v2254_v54 = vpop.permute.xlu1 %2253 }
 0x5c0   : > { %2563 = vmatprep.mubr.bf16.mxu0 %v4093_v0 }
 0x5c1   : > { %v2259_v56 = vpop.permute.xlu0 %2258 }
 0x5c7   : > { %3815 = vmatmul.mubr.msk.bf16.gmra.mrb[152].mxu0 %vm386_vm0, %v4018_v40 }
 0x5c8   : > { %2573 = vmatprep.mubr.bf16.mxu0 %v4093_v0 }
 0x5c9   : > { %v2264_v7 = vpop.permute.xlu1 %2263 }
 0x5cf   : > { %3816 = vmatmul.mubr.msk.bf16.gmra.mrb[156].mxu0 %vm386_vm0, %v4019_v41 }
 0x5d0   : > { %2583 = vmatprep.mubr.bf16.mxu0 %v4093_v0 }
 0x5d7   : > { %3817 = vmatmul.mubr.msk.bf16.gmra.mrb[160].mxu0 %vm386_vm0, %v4020_v43 }
 0x5d8   : > { %2593 = vmatprep.mubr.bf16.mxu0 %v4093_v0 }
 0x5df   : > { %3818 = vmatmul.mubr.msk.bf16.gmra.mrb[164].mxu0 %vm386_vm0, %v4021_v44 }
 0x5e0   : > { %2603 = vmatprep.mubr.bf16.mxu0 %v4093_v0 }
 0x5e7   : > { %3819 = vmatmul.mubr.msk.bf16.gmra.mrb[168].mxu0 %vm386_vm0, %v4022_v45 }
 0x5e8   : > { %2613 = vmatprep.mubr.bf16.mxu0 %v4093_v0 }
 0x5ef   : > { %3820 = vmatmul.mubr.msk.bf16.gmra.mrb[172].mxu0 %vm386_vm0, %v4023_v46 }
 0x5f0   : > { %2623 = vmatprep.mubr.bf16.mxu0 %v4093_v0 }
 0x5f7   : > { %3821 = vmatmul.mubr.msk.bf16.gmra.mrb[176].mxu0 %vm386_vm0, %v4024_v47 }
 0x5f8   : > { %2633 = vmatprep.mubr.bf16.mxu0 %v4093_v0 }
 0x5ff   : > { %3822 = vmatmul.mubr.msk.bf16.gmra.mrb[180].mxu0 %vm386_vm0, %v4025_v48 }
 0x600   : > { %2643 = vmatprep.mubr.bf16.mxu0 %v4093_v0 }
 0x607   : > { %3823 = vmatmul.mubr.msk.bf16.gmra.mrb[184].mxu0 %vm386_vm0, %v4026_v49 }
 0x608   : > { %2653 = vmatprep.mubr.bf16.mxu0 %v4093_v0 }
 0x60f   : > { %3824 = vmatmul.mubr.msk.bf16.gmra.mrb[188].mxu0 %vm386_vm0, %v4027_v50 }
 0x610   : > { %2663 = vmatprep.mubr.bf16.mxu0 %v4093_v0 }
 0x617   : > { %3825 = vmatmul.mubr.msk.bf16.gmra.mrb[192].mxu0 %vm386_vm0, %v4028_v51 }
 0x618   : > { %2673 = vmatprep.mubr.bf16.mxu0 %v4093_v0 }
 0x61f   : > { %3826 = vmatmul.mubr.msk.bf16.gmra.mrb[196].mxu0 %vm386_vm0, %v4029_v52 }
 0x620   : > { %2683 = vmatprep.mubr.bf16.mxu0 %v4093_v0 }
 0x627   : > { %3827 = vmatmul.mubr.msk.bf16.gmra.mrb[200].mxu0 %vm386_vm0, %v4030_v53 }
 0x672   : > { %v2317_v55 = vpop.f32.mrb[132].mxu0 }
 0x673   : > { %v2318_v57 = vadd.f32 %v2317_v55, %v2254_v54  ;;  %v2319_v58 = vpop.f32.mrb[133].mxu0 }
 0x674   : > { %v2320_v59 = vadd.f32 %v2319_v58, %v2254_v54  ;;  %v2321_v60 = vpop.f32.mrb[134].mxu0 }
 0x675   : > { %2334 = vst [vmem:[%s4353_s5 + $0x30] sm:$0xff] %v2318_v57  ;;  %v2322_v61 = vadd.f32 %v2321_v60, %v2259_v56  ;;  %v2323_v62 = vpop.f32.mrb[135].mxu0 }
 0x676   : > { %2335 = vst [vmem:[%s4353_s5 + $0x38] sm:$0xff] %v2320_v59  ;;  %v2324_v63 = vadd.f32 %v2323_v62, %v2259_v56 }
 0x677   : > { %2336 = vst [vmem:[%s4353_s5 + $0x40] sm:$0xff] %v2322_v61 }
 0x678   : > { %2337 = vst [vmem:[%s4353_s5 + $0x48] sm:$0xff] %v2324_v63 }
 0x67a   : > { %v2327_v8 = vpop.f32.mrb[136].mxu0 }
 0x67b   : > { %v2328_v9 = vadd.f32 %v2327_v8, %v2264_v7  ;;  %v2329_v10 = vpop.f32.mrb[137].mxu0 }
 0x67c   : > { %v2330_v11 = vadd.f32 %v2329_v10, %v2264_v7  ;;  %v2331_v12 = vpop.f32.mrb[138].mxu0 }
 0x67d   : > { %2338 = vst [vmem:[%s4353_s5 + $0x50] sm:$0xff] %v2328_v9  ;;  %v2332_v13 = vpop.f32.mrb[139].mxu0 }
 0x67e   : > { %2339 = vst [vmem:[%s4353_s5 + $0x58] sm:$0xff] %v2330_v11 }
 0x682   : > { %v2535_v14 = vpop.f32.mrb[140].mxu0 }
 0x683   : > { %v2537_v16 = vpop.f32.mrb[141].mxu0  ;;  %v2694_v6 = vmax.f32 %v2535_v14, 0.0 }
 0x684   : > { %v2539_v4 = vpop.f32.mrb[142].mxu0  ;;  %v2695_v20 = vmax.f32 %v2537_v16, 0.0 }
 0x685   : > { %v2696_v24 = vmax.f32 %v2539_v4, 0.0  ;;  %v2541_v19 = vpop.f32.mrb[143].mxu0 }
 0x686   : > { %v2697_v21 = vmax.f32 %v2541_v19, 0.0 }
 0x687   : > { %v2758_v22 = vpack.c.bf16 %v2696_v24, %v2694_v6 }
 0x688   : > { %v2759_v23 = vpack.c.bf16 %v2697_v21, %v2695_v20 }
 0x68a   : > { %v2545_v25 = vpop.f32.mrb[144].mxu0  ;;  %2804 = vmatprep.subr.bf16.mxu1 %v2759_v23 }
 0x68b   : > { %v2547_v26 = vpop.f32.mrb[145].mxu0  ;;  %2805 = vmatpush1.bf16.msra.mxu1 %v2758_v22  ;;  %v2698_v28 = vmax.f32 %v2545_v25, 0.0 }
 0x68c   : > { %v2549_v27 = vpop.f32.mrb[146].mxu0  ;;  %v2699_v31 = vmax.f32 %v2547_v26, 0.0 }
 0x68d   : > { %v2700_v29 = vmax.f32 %v2549_v27, 0.0  ;;  %v2551_v30 = vpop.f32.mrb[147].mxu0 }
 0x68e   : > { %v2701_v32 = vmax.f32 %v2551_v30, 0.0 }
 0x68f   : > { %v2760_v33 = vpack.c.bf16 %v2700_v29, %v2698_v28 }
 0x690   : > { %v2761_v34 = vpack.c.bf16 %v2701_v32, %v2699_v31 }
 0x692   : > { %v2555_v35 = vpop.f32.mrb[148].mxu0  ;;  %2806 = vmatprep.subr.bf16.mxu1 %v2761_v34 }
 0x693   : > { %v2557_v3 = vpop.f32.mrb[149].mxu0  ;;  %2807 = vmatpush1.bf16.msra.mxu1 %v2760_v33  ;;  %v2702_v38 = vmax.f32 %v2555_v35, 0.0 }
 0x694   : > { %v2559_v37 = vpop.f32.mrb[150].mxu0  ;;  %v2703_v41 = vmax.f32 %v2557_v3, 0.0 }
 0x695   : > { %v2704_v39 = vmax.f32 %v2559_v37, 0.0  ;;  %v2561_v40 = vpop.f32.mrb[151].mxu0 }
 0x696   : > { %v2705_v43 = vmax.f32 %v2561_v40, 0.0 }
 0x697   : > { %v2762_v44 = vpack.c.bf16 %v2704_v39, %v2702_v38 }
 0x698   : > { %v2763_v45 = vpack.c.bf16 %v2705_v43, %v2703_v41 }
 0x69a   : > { %v2565_v46 = vpop.f32.mrb[152].mxu0  ;;  %2808 = vmatprep.subr.bf16.mxu1 %v2763_v45 }
 0x69b   : > { %v2567_v47 = vpop.f32.mrb[153].mxu0  ;;  %2809 = vmatpush1.bf16.msra.mxu1 %v2762_v44  ;;  %v2706_v49 = vmax.f32 %v2565_v46, 0.0 }
 0x69c   : > { %v2569_v48 = vpop.f32.mrb[154].mxu0  ;;  %v2707_v52 = vmax.f32 %v2567_v47, 0.0 }
 0x69d   : > { %v2708_v50 = vmax.f32 %v2569_v48, 0.0  ;;  %v2571_v51 = vpop.f32.mrb[155].mxu0 }
 0x69e   : > { %v2709_v53 = vmax.f32 %v2571_v51, 0.0 }
 0x69f   : > { %v2764_v54 = vpack.c.bf16 %v2708_v50, %v2706_v49 }
 0x6a0   : > { %v2765_v55 = vpack.c.bf16 %v2709_v53, %v2707_v52 }
 0x6a2   : > { %v2575_v56 = vpop.f32.mrb[156].mxu0  ;;  %2810 = vmatprep.subr.bf16.mxu1 %v2765_v55 }
 0x6a3   : > { %v2577_v57 = vpop.f32.mrb[157].mxu0  ;;  %2811 = vmatpush1.bf16.msra.mxu1 %v2764_v54  ;;  %v2710_v59 = vmax.f32 %v2575_v56, 0.0 }
 0x6a4   : > { %v2579_v58 = vpop.f32.mrb[158].mxu0  ;;  %v2711_v62 = vmax.f32 %v2577_v57, 0.0 }
 0x6a5   : > { %v2712_v60 = vmax.f32 %v2579_v58, 0.0  ;;  %v2581_v61 = vpop.f32.mrb[159].mxu0 }
 0x6a6   : > { %v2713_v63 = vmax.f32 %v2581_v61, 0.0 }
 0x6a7   : > { %v2766_v7 = vpack.c.bf16 %v2712_v60, %v2710_v59 }
 0x6a8   : > { %v2767_v8 = vpack.c.bf16 %v2713_v63, %v2711_v62 }
 0x6aa   : > { %v2585_v9 = vpop.f32.mrb[160].mxu0  ;;  %2812 = vmatprep.subr.bf16.mxu1 %v2767_v8 }
 0x6ab   : > { %v2587_v10 = vpop.f32.mrb[161].mxu0  ;;  %2813 = vmatpush1.bf16.msra.mxu1 %v2766_v7  ;;  %v2714_v12 = vmax.f32 %v2585_v9, 0.0 }
 0x6ac   : > { %v2589_v11 = vpop.f32.mrb[162].mxu0  ;;  %v2715_v16 = vmax.f32 %v2587_v10, 0.0 }
 0x6ad   : > { %v2716_v13 = vmax.f32 %v2589_v11, 0.0  ;;  %v2591_v14 = vpop.f32.mrb[163].mxu0 }
 0x6ae   : > { %v2717_v17 = vmax.f32 %v2591_v14, 0.0  ;;  %v2791_v14 = vld [vmem:[%s4855_s3 + $0x30] sm:$0xff] }
 0x6af   : > { %v2768_v4 = vpack.c.bf16 %v2716_v13, %v2714_v12  ;;  %2794 = vperm.xlu0 %3929, %v2791_v14   ;;  %v4045_v14 = vld [vmem:[%s4853_s1 + $0x2e0] sm:$0xff]  }
 0x6b0   : > { %v2769_v6 = vpack.c.bf16 %v2717_v17, %v2715_v16 }
 0x6b2   : > { %v2595_v24 = vpop.f32.mrb[164].mxu0  ;;  %2814 = vmatprep.subr.bf16.mxu1 %v2769_v6 }
 0x6b3   : > { %v2597_v19 = vpop.f32.mrb[165].mxu0  ;;  %2815 = vmatpush1.bf16.msra.mxu1 %v2768_v4  ;;  %v2718_v21 = vmax.f32 %v2595_v24, 0.0 }
 0x6b4   : > { %v2599_v20 = vpop.f32.mrb[166].mxu0  ;;  %v2719_v25 = vmax.f32 %v2597_v19, 0.0 }
 0x6b5   : > { %v2720_v22 = vmax.f32 %v2599_v20, 0.0  ;;  %v2601_v23 = vpop.f32.mrb[167].mxu0 }
 0x6b6   : > { %v2721_v26 = vmax.f32 %v2601_v23, 0.0 }
 0x6b7   : > { %v2770_v27 = vpack.c.bf16 %v2720_v22, %v2718_v21 }
 0x6b8   : > { %v2771_v28 = vpack.c.bf16 %v2721_v26, %v2719_v25 }
 0x6ba   : > { %v2605_v29 = vpop.f32.mrb[168].mxu0  ;;  %2816 = vmatprep.subr.bf16.mxu1 %v2771_v28 }
 0x6bb   : > { %v2607_v30 = vpop.f32.mrb[169].mxu0  ;;  %2817 = vmatpush1.bf16.msra.mxu1 %v2770_v27  ;;  %v2722_v32 = vmax.f32 %v2605_v29, 0.0 }
 0x6bc   : > { %v2609_v31 = vpop.f32.mrb[170].mxu0  ;;  %v2723_v35 = vmax.f32 %v2607_v30, 0.0 }
 0x6bd   : > { %v2724_v33 = vmax.f32 %v2609_v31, 0.0  ;;  %v2611_v34 = vpop.f32.mrb[171].mxu0 }
 0x6be   : > { %v2725_v3 = vmax.f32 %v2611_v34, 0.0 }
 0x6bf   : > { %v2772_v37 = vpack.c.bf16 %v2724_v33, %v2722_v32 }
 0x6c0   : > { %v2773_v38 = vpack.c.bf16 %v2725_v3, %v2723_v35 }
 0x6c2   : > { %v2615_v39 = vpop.f32.mrb[172].mxu0  ;;  %2818 = vmatprep.subr.bf16.mxu1 %v2773_v38 }
 0x6c3   : > { %v2617_v40 = vpop.f32.mrb[173].mxu0  ;;  %2819 = vmatpush1.bf16.msra.mxu1 %v2772_v37  ;;  %v2726_v43 = vmax.f32 %v2615_v39, 0.0 }
 0x6c4   : > { %v2619_v41 = vpop.f32.mrb[174].mxu0  ;;  %v2727_v46 = vmax.f32 %v2617_v40, 0.0 }
 0x6c5   : > { %v2728_v44 = vmax.f32 %v2619_v41, 0.0  ;;  %v2621_v45 = vpop.f32.mrb[175].mxu0 }
 0x6c6   : > { %v2729_v47 = vmax.f32 %v2621_v45, 0.0 }
 0x6c7   : > { %v2774_v48 = vpack.c.bf16 %v2728_v44, %v2726_v43 }
 0x6c8   : > { %v2775_v49 = vpack.c.bf16 %v2729_v47, %v2727_v46 }
 0x6ca   : > { %v2625_v50 = vpop.f32.mrb[176].mxu0  ;;  %2820 = vmatprep.subr.bf16.mxu1 %v2775_v49 }
 0x6cb   : > { %v2627_v51 = vpop.f32.mrb[177].mxu0  ;;  %2821 = vmatpush1.bf16.msra.mxu1 %v2774_v48  ;;  %v2730_v53 = vmax.f32 %v2625_v50, 0.0 }
 0x6cc   : > { %v2629_v52 = vpop.f32.mrb[178].mxu0  ;;  %v2731_v56 = vmax.f32 %v2627_v51, 0.0 }
 0x6cd   : > { %v2732_v54 = vmax.f32 %v2629_v52, 0.0  ;;  %v2631_v55 = vpop.f32.mrb[179].mxu0 }
 0x6ce   : > { %v2733_v57 = vmax.f32 %v2631_v55, 0.0 }
 0x6cf   : > { %v2776_v58 = vpack.c.bf16 %v2732_v54, %v2730_v53 }
 0x6d0   : > { %v2777_v59 = vpack.c.bf16 %v2733_v57, %v2731_v56 }
 0x6d2   : > { %v2635_v60 = vpop.f32.mrb[180].mxu0  ;;  %2822 = vmatprep.subr.bf16.mxu1 %v2777_v59 }
 0x6d3   : > { %v2637_v61 = vpop.f32.mrb[181].mxu0  ;;  %2823 = vmatpush1.bf16.msra.mxu1 %v2776_v58  ;;  %v2734_v63 = vmax.f32 %v2635_v60, 0.0 }
 0x6d4   : > { %v2639_v62 = vpop.f32.mrb[182].mxu0  ;;  %v2735_v9 = vmax.f32 %v2637_v61, 0.0 }
 0x6d5   : > { %v2736_v7 = vmax.f32 %v2639_v62, 0.0  ;;  %v2641_v8 = vpop.f32.mrb[183].mxu0 }
 0x6d6   : > { %v2737_v10 = vmax.f32 %v2641_v8, 0.0  ;;  %v3828_v8 = vcombine.low %v4706_v15, %v4706_v15  ;;  %v4040_v15 = vld [vmem:[%s4853_s1 + $0x2b8] sm:$0xff]  }
 0x6d7   : > { %v2778_v11 = vpack.c.bf16 %v2736_v7, %v2734_v63 }
 0x6d8   : > { %v2779_v12 = vpack.c.bf16 %v2737_v10, %v2735_v9  ;;  %v4033_v9 = vld [vmem:[%s4853_s1 + $0x280] sm:$0xff]  }
 0x6d9   : > { %v4041_v10 = vld [vmem:[%s4853_s1 + $0x2c0] sm:$0xff]  }
 0x6da   : > { %v2645_v13 = vpop.f32.mrb[184].mxu0  ;;  %2824 = vmatprep.subr.bf16.mxu1 %v2779_v12  ;;  %v4043_v12 = vld [vmem:[%s4853_s1 + $0x2d0] sm:$0xff]  }
 0x6db   : > { %v2647_v16 = vpop.f32.mrb[185].mxu0  ;;  %2825 = vmatpush1.bf16.msra.mxu1 %v2778_v11  ;;  %v2738_v4 = vmax.f32 %v2645_v13, 0.0  ;;  %v4042_v11 = vld [vmem:[%s4853_s1 + $0x2c8] sm:$0xff]   ;;  %v4044_v13 = vld [vmem:[%s4853_s1 + $0x2d8] sm:$0xff]  }
 0x6dc   : > { %v2649_v17 = vpop.f32.mrb[186].mxu0  ;;  %v2739_v19 = vmax.f32 %v2647_v16, 0.0  ;;  %v4046_v16 = vld [vmem:[%s4853_s1 + $0x2e8] sm:$0xff]  }
 0x6dd   : > { %v2740_v6 = vmax.f32 %v2649_v17, 0.0  ;;  %v2651_v24 = vpop.f32.mrb[187].mxu0  ;;  %v4047_v17 = vld [vmem:[%s4853_s1 + $0x2f0] sm:$0xff]  }
 0x6de   : > { %v2741_v20 = vmax.f32 %v2651_v24, 0.0 }
 0x6df   : > { %v2780_v21 = vpack.c.bf16 %v2740_v6, %v2738_v4  ;;  %v4048_v4 = vld [vmem:[%s4853_s1 + $0x2f8] sm:$0xff]  }
 0x6e0   : > { %v2781_v22 = vpack.c.bf16 %v2741_v20, %v2739_v19 }
 0x6e2   : > { %v2655_v23 = vpop.f32.mrb[188].mxu0  ;;  %2826 = vmatprep.subr.bf16.mxu1 %v2781_v22 }
 0x6e3   : > { %v2657_v25 = vpop.f32.mrb[189].mxu0  ;;  %2827 = vmatpush1.bf16.msra.mxu1 %v2780_v21  ;;  %v2742_v27 = vmax.f32 %v2655_v23, 0.0 }
 0x6e4   : > { %v2659_v26 = vpop.f32.mrb[190].mxu0  ;;  %v2743_v30 = vmax.f32 %v2657_v25, 0.0 }
 0x6e5   : > { %v2744_v28 = vmax.f32 %v2659_v26, 0.0  ;;  %v2661_v29 = vpop.f32.mrb[191].mxu0 }
 0x6e6   : > { %v2745_v31 = vmax.f32 %v2661_v29, 0.0 }
 0x6e7   : > { %v2782_v32 = vpack.c.bf16 %v2744_v28, %v2742_v27 }
 0x6e8   : > { %v2783_v33 = vpack.c.bf16 %v2745_v31, %v2743_v30 }
 0x6ea   : > { %v2665_v34 = vpop.f32.mrb[192].mxu0  ;;  %2828 = vmatprep.subr.bf16.mxu1 %v2783_v33 }
 0x6eb   : > { %v2667_v35 = vpop.f32.mrb[193].mxu0  ;;  %2829 = vmatpush1.bf16.msra.mxu1 %v2782_v32  ;;  %v2746_v37 = vmax.f32 %v2665_v34, 0.0 }
 0x6ec   : > { %v2669_v3 = vpop.f32.mrb[194].mxu0  ;;  %v2747_v40 = vmax.f32 %v2667_v35, 0.0 }
 0x6ed   : > { %v2748_v38 = vmax.f32 %v2669_v3, 0.0  ;;  %v2671_v39 = vpop.f32.mrb[195].mxu0 }
 0x6ee   : > { %v2749_v41 = vmax.f32 %v2671_v39, 0.0 }
 0x6ef   : > { %v2784_v43 = vpack.c.bf16 %v2748_v38, %v2746_v37 }
 0x6f0   : > { %v2785_v44 = vpack.c.bf16 %v2749_v41, %v2747_v40 }
 0x6f2   : > { %v2675_v45 = vpop.f32.mrb[196].mxu0  ;;  %2830 = vmatprep.subr.bf16.mxu1 %v2785_v44 }
 0x6f3   : > { %v2677_v46 = vpop.f32.mrb[197].mxu0  ;;  %2831 = vmatpush1.bf16.msra.mxu1 %v2784_v43  ;;  %v2750_v48 = vmax.f32 %v2675_v45, 0.0 }
 0x6f4   : > { %v2679_v47 = vpop.f32.mrb[198].mxu0  ;;  %v2751_v51 = vmax.f32 %v2677_v46, 0.0 }
 0x6f5   : > { %v2752_v49 = vmax.f32 %v2679_v47, 0.0  ;;  %v2681_v50 = vpop.f32.mrb[199].mxu0 }
 0x6f6   : > { %v2753_v52 = vmax.f32 %v2681_v50, 0.0 }
 0x6f7   : > { %v2786_v53 = vpack.c.bf16 %v2752_v49, %v2750_v48 }
 0x6f8   : > { %v2787_v54 = vpack.c.bf16 %v2753_v52, %v2751_v51 }
 0x6fa   : > { %v2685_v55 = vpop.f32.mrb[200].mxu0  ;;  %2832 = vmatprep.subr.bf16.mxu1 %v2787_v54  ;;  %v3302_v54 = vld [vmem:[%s4855_s3 + $0x38] sm:$0xff] }
 0x6fb   : > { %v2687_v56 = vpop.f32.mrb[201].mxu0  ;;  %2833 = vmatpush1.bf16.msra.mxu1 %v2786_v53  ;;  %v2754_v58 = vmax.f32 %v2685_v55, 0.0  ;;  %v3303_v55 = vld [vmem:[%s4855_s3 + $0x40] sm:$0xff]  ;;  %3309 = vperm.xlu1 %3930, %v3302_v54  }
 0x6fc   : > { %v2689_v57 = vpop.f32.mrb[202].mxu0  ;;  %v2755_v61 = vmax.f32 %v2687_v56, 0.0  ;;  %3314 = vperm.xlu0 %3929, %v3303_v55  }
 0x6fd   : > { %v2756_v59 = vmax.f32 %v2689_v57, 0.0  ;;  %v2691_v60 = vpop.f32.mrb[203].mxu0 }
 0x6fe   : > { %v2757_v62 = vmax.f32 %v2691_v60, 0.0 }
 0x6ff   : > { %v2788_v63 = vpack.c.bf16 %v2756_v59, %v2754_v58  ;;  %v3304_v58 = vld [vmem:[%s4855_s3 + $0x48] sm:$0xff]  ;;  %v3305_v59 = vld [vmem:[%s4855_s3 + $0x50] sm:$0xff] }
 0x700   : > { %v2789_v7 = vpack.c.bf16 %v2757_v62, %v2755_v61  ;;  %3319 = vperm.xlu1 %3930, %v3304_v58   ;;  %3324 = vperm.xlu0 %3929, %v3305_v59  }
 0x702   : > { %2834 = vmatprep.subr.bf16.mxu1 %v2789_v7 }
 0x703   : > { %2835 = vmatpush1.bf16.msra.mxu1 %v2788_v63  ;;  %v3306_v63 = vld [vmem:[%s4855_s3 + $0x58] sm:$0xff] }
 0x704   : > { %3008 = vmatprep.subr.bf16.mxu1 %v4594_v18  ;;  %v4034_v18 = vld [vmem:[%s4853_s1 + $0x288] sm:$0xff]   ;;  %3329 = vperm.xlu1 %3930, %v3306_v63  }
 0x706   : > { %2837 = vmatmul.mubr.bf16.vlgmr.msra.gmra.mrb[136].mxu1 %v3828_v8 }
 0x707   : > { %3009 = vmatpush1.bf16.msra.mxu1 %v4598_v1  ;;  %3040 = vmatprep.mubr.bf16.mxu1 %v4093_v0  ;;  %v4035_v1 = vld [vmem:[%s4853_s1 + $0x290] sm:$0xff]  }
 0x708   : > { %3010 = vmatprep.subr.bf16.mxu1 %v4602_v2  ;;  %v4036_v2 = vld [vmem:[%s4853_s1 + $0x298] sm:$0xff]  }
 0x70b   : > { %3011 = vmatpush1.bf16.msra.mxu1 %v4606_v36  ;;  %v4037_v36 = vld [vmem:[%s4853_s1 + $0x2a0] sm:$0xff]  }
 0x70c   : > { %3012 = vmatprep.subr.bf16.mxu1 %v4610_v5  ;;  %v4038_v5 = vld [vmem:[%s4853_s1 + $0x2a8] sm:$0xff]  }
 0x70f   : > { %3013 = vmatpush1.bf16.msra.mxu1 %v4614_v42  ;;  %v4039_v42 = vld [vmem:[%s4853_s1 + $0x2b0] sm:$0xff]  }
 0x712   : > { %3878 = vmatmul.mubr.msk.bf16.vlgmr.msra.gmra.mrb[140].mxu1 %vm386_vm0, %v4033_v9 }
 0x713   : > { %3050 = vmatprep.mubr.bf16.mxu1 %v4093_v0 }
 0x71a   : > { %3879 = vmatmul.mubr.msk.bf16.gmra.mrb[144].mxu1 %vm386_vm0, %v4034_v18 }
 0x71b   : > { %3060 = vmatprep.mubr.bf16.mxu1 %v4093_v0 }
 0x722   : > { %3880 = vmatmul.mubr.msk.bf16.gmra.mrb[148].mxu1 %vm386_vm0, %v4035_v1 }
 0x723   : > { %3070 = vmatprep.mubr.bf16.mxu1 %v4093_v0 }
 0x72a   : > { %3881 = vmatmul.mubr.msk.bf16.gmra.mrb[152].mxu1 %vm386_vm0, %v4036_v2 }
 0x72b   : > { %3080 = vmatprep.mubr.bf16.mxu1 %v4093_v0 }
 0x72e   : > { %v2795_v6 = vpop.permute.xlu0 %2794 }
 0x732   : > { %3882 = vmatmul.mubr.msk.bf16.gmra.mrb[156].mxu1 %vm386_vm0, %v4037_v36 }
 0x733   : > { %3090 = vmatprep.mubr.bf16.mxu1 %v4093_v0 }
 0x73a   : > { %3883 = vmatmul.mubr.msk.bf16.gmra.mrb[160].mxu1 %vm386_vm0, %v4038_v5 }
 0x73b   : > { %3100 = vmatprep.mubr.bf16.mxu1 %v4093_v0 }
 0x742   : > { %3884 = vmatmul.mubr.msk.bf16.gmra.mrb[164].mxu1 %vm386_vm0, %v4039_v42 }
 0x743   : > { %3110 = vmatprep.mubr.bf16.mxu1 %v4093_v0 }
 0x74a   : > { %3885 = vmatmul.mubr.msk.bf16.gmra.mrb[168].mxu1 %vm386_vm0, %v4040_v15 }
 0x74b   : > { %3120 = vmatprep.mubr.bf16.mxu1 %v4093_v0 }
 0x752   : > { %3886 = vmatmul.mubr.msk.bf16.gmra.mrb[172].mxu1 %vm386_vm0, %v4041_v10 }
 0x753   : > { %3130 = vmatprep.mubr.bf16.mxu1 %v4093_v0 }
 0x75a   : > { %3887 = vmatmul.mubr.msk.bf16.gmra.mrb[176].mxu1 %vm386_vm0, %v4042_v11 }
 0x75b   : > { %3140 = vmatprep.mubr.bf16.mxu1 %v4093_v0 }
 0x762   : > { %3888 = vmatmul.mubr.msk.bf16.gmra.mrb[180].mxu1 %vm386_vm0, %v4043_v12 }
 0x763   : > { %3150 = vmatprep.mubr.bf16.mxu1 %v4093_v0 }
 0x76a   : > { %3889 = vmatmul.mubr.msk.bf16.gmra.mrb[184].mxu1 %vm386_vm0, %v4044_v13 }
 0x76b   : > { %3160 = vmatprep.mubr.bf16.mxu1 %v4093_v0 }
 0x772   : > { %3890 = vmatmul.mubr.msk.bf16.gmra.mrb[188].mxu1 %vm386_vm0, %v4045_v14 }
 0x773   : > { %3170 = vmatprep.mubr.bf16.mxu1 %v4093_v0 }
 0x77a   : > { %3891 = vmatmul.mubr.msk.bf16.gmra.mrb[192].mxu1 %vm386_vm0, %v4046_v16 }
 0x77b   : > { %3180 = vmatprep.mubr.bf16.mxu1 %v4093_v0 }
 0x782   : > { %3892 = vmatmul.mubr.msk.bf16.gmra.mrb[196].mxu1 %vm386_vm0, %v4047_v17 }
 0x783   : > { %3190 = vmatprep.mubr.bf16.mxu1 %v4093_v0  ;;  %v4051_v0 = vld [vmem:[%s4854_s2 + $0x3c] ss:$8 sps:$4 sm:$0xff]  }
 0x784   : > { %3391 = vmatprep.mubr.bf16.mxu0 %v4051_v0 }
 0x78a   : > { %3893 = vmatmul.mubr.msk.bf16.gmra.mrb[200].mxu1 %vm386_vm0, %v4048_v4 }
 0x7d9   : > { %v2838_v24 = vpop.f32.mrb[136].mxu1 }
 0x7da   : > { %v2839_v19 = vadd.f32 %v2838_v24, %v2795_v6  ;;  %v2840_v20 = vpop.f32.mrb[137].mxu1 }
 0x7db   : > { %v2841_v21 = vadd.f32 %v2840_v20, %v2795_v6  ;;  %v2842_v22 = vpop.f32.mrb[138].mxu1 }
 0x7dc   : > { %2845 = vst [vmem:[%s4353_s5 + $0x60] sm:$0xff] %v2839_v19  ;;  %v2843_v23 = vpop.f32.mrb[139].mxu1 }
 0x7dd   : > { %2846 = vst [vmem:[%s4353_s5 + $0x68] sm:$0xff] %v2841_v21 }
 0x7e5   : > { %v3042_v25 = vpop.f32.mrb[140].mxu1 }
 0x7e6   : > { %v3044_v26 = vpop.f32.mrb[141].mxu1  ;;  %v3201_v28 = vmax.f32 %v3042_v25, 0.0 }
 0x7e7   : > { %v3046_v27 = vpop.f32.mrb[142].mxu1  ;;  %v3202_v31 = vmax.f32 %v3044_v26, 0.0 }
 0x7e8   : > { %v3203_v29 = vmax.f32 %v3046_v27, 0.0  ;;  %v3048_v30 = vpop.f32.mrb[143].mxu1 }
 0x7e9   : > { %v3204_v32 = vmax.f32 %v3048_v30, 0.0 }
 0x7ea   : > { %v3265_v33 = vpack.c.bf16 %v3203_v29, %v3201_v28 }
 0x7eb   : > { %v3266_v34 = vpack.c.bf16 %v3204_v32, %v3202_v31 }
 0x7ed   : > { %v3052_v35 = vpop.f32.mrb[144].mxu1  ;;  %3359 = vmatprep.subr.bf16.mxu0 %v3266_v34 }
 0x7ee   : > { %v3054_v3 = vpop.f32.mrb[145].mxu1  ;;  %3360 = vmatpush1.bf16.msra.mxu0 %v3265_v33  ;;  %v3205_v38 = vmax.f32 %v3052_v35, 0.0 }
 0x7ef   : > { %v3056_v37 = vpop.f32.mrb[146].mxu1  ;;  %v3206_v41 = vmax.f32 %v3054_v3, 0.0 }
 0x7f0   : > { %v3207_v39 = vmax.f32 %v3056_v37, 0.0  ;;  %v3058_v40 = vpop.f32.mrb[147].mxu1 }
 0x7f1   : > { %v3208_v43 = vmax.f32 %v3058_v40, 0.0 }
 0x7f2   : > { %v3267_v44 = vpack.c.bf16 %v3207_v39, %v3205_v38 }
 0x7f3   : > { %v3268_v45 = vpack.c.bf16 %v3208_v43, %v3206_v41 }
 0x7f5   : > { %v3062_v46 = vpop.f32.mrb[148].mxu1  ;;  %3361 = vmatprep.subr.bf16.mxu0 %v3268_v45 }
 0x7f6   : > { %v3064_v47 = vpop.f32.mrb[149].mxu1  ;;  %3362 = vmatpush1.bf16.msra.mxu0 %v3267_v44  ;;  %v3209_v49 = vmax.f32 %v3062_v46, 0.0 }
 0x7f7   : > { %v3066_v48 = vpop.f32.mrb[150].mxu1  ;;  %v3210_v52 = vmax.f32 %v3064_v47, 0.0 }
 0x7f8   : > { %v3211_v50 = vmax.f32 %v3066_v48, 0.0  ;;  %v3068_v51 = vpop.f32.mrb[151].mxu1 }
 0x7f9   : > { %v3212_v53 = vmax.f32 %v3068_v51, 0.0 }
 0x7fa   : > { %v3269_v56 = vpack.c.bf16 %v3211_v50, %v3209_v49 }
 0x7fb   : > { %v3270_v57 = vpack.c.bf16 %v3212_v53, %v3210_v52 }
 0x7fd   : > { %v3072_v60 = vpop.f32.mrb[152].mxu1  ;;  %3363 = vmatprep.subr.bf16.mxu0 %v3270_v57 }
 0x7fe   : > { %v3074_v61 = vpop.f32.mrb[153].mxu1  ;;  %3364 = vmatpush1.bf16.msra.mxu0 %v3269_v56  ;;  %v3213_v7 = vmax.f32 %v3072_v60, 0.0 }
 0x7ff   : > { %v3076_v62 = vpop.f32.mrb[154].mxu1  ;;  %v3214_v18 = vmax.f32 %v3074_v61, 0.0 }
 0x800   : > { %v3215_v8 = vmax.f32 %v3076_v62, 0.0  ;;  %v3078_v9 = vpop.f32.mrb[155].mxu1 }
 0x801   : > { %v3216_v1 = vmax.f32 %v3078_v9, 0.0 }
 0x802   : > { %v3271_v2 = vpack.c.bf16 %v3215_v8, %v3213_v7 }
 0x803   : > { %v3272_v36 = vpack.c.bf16 %v3216_v1, %v3214_v18 }
 0x805   : > { %v3082_v5 = vpop.f32.mrb[156].mxu1  ;;  %3365 = vmatprep.subr.bf16.mxu0 %v3272_v36 }
 0x806   : > { %v3084_v42 = vpop.f32.mrb[157].mxu1  ;;  %3366 = vmatpush1.bf16.msra.mxu0 %v3271_v2  ;;  %v3217_v10 = vmax.f32 %v3082_v5, 0.0 }
 0x807   : > { %v3086_v15 = vpop.f32.mrb[158].mxu1  ;;  %v3218_v13 = vmax.f32 %v3084_v42, 0.0 }
 0x808   : > { %v3219_v11 = vmax.f32 %v3086_v15, 0.0  ;;  %v3088_v12 = vpop.f32.mrb[159].mxu1 }
 0x809   : > { %v3220_v14 = vmax.f32 %v3088_v12, 0.0 }
 0x80a   : > { %v3273_v16 = vpack.c.bf16 %v3219_v11, %v3217_v10 }
 0x80b   : > { %v3274_v17 = vpack.c.bf16 %v3220_v14, %v3218_v13 }
 0x80d   : > { %v3092_v4 = vpop.f32.mrb[160].mxu1  ;;  %3367 = vmatprep.subr.bf16.mxu0 %v3274_v17 }
 0x80e   : > { %v3094_v6 = vpop.f32.mrb[161].mxu1  ;;  %3368 = vmatpush1.bf16.msra.mxu0 %v3273_v16  ;;  %v3221_v19 = vmax.f32 %v3092_v4, 0.0 }
 0x80f   : > { %v3096_v24 = vpop.f32.mrb[162].mxu1  ;;  %v3222_v22 = vmax.f32 %v3094_v6, 0.0 }
 0x810   : > { %v3223_v20 = vmax.f32 %v3096_v24, 0.0  ;;  %v3098_v21 = vpop.f32.mrb[163].mxu1 }
 0x811   : > { %v3224_v23 = vmax.f32 %v3098_v21, 0.0 }
 0x812   : > { %v3275_v25 = vpack.c.bf16 %v3223_v20, %v3221_v19 }
 0x813   : > { %v3276_v26 = vpack.c.bf16 %v3224_v23, %v3222_v22 }
 0x815   : > { %v3102_v0 = vpop.f32.mrb[164].mxu1  ;;  %3369 = vmatprep.subr.bf16.mxu0 %v3276_v26 }
 0x816   : > { %v3104_v27 = vpop.f32.mrb[165].mxu1  ;;  %3370 = vmatpush1.bf16.msra.mxu0 %v3275_v25  ;;  %v3225_v29 = vmax.f32 %v3102_v0, 0.0 }
 0x817   : > { %v3106_v28 = vpop.f32.mrb[166].mxu1  ;;  %v3226_v32 = vmax.f32 %v3104_v27, 0.0 }
 0x818   : > { %v3227_v30 = vmax.f32 %v3106_v28, 0.0  ;;  %v3108_v31 = vpop.f32.mrb[167].mxu1 }
 0x819   : > { %v3228_v33 = vmax.f32 %v3108_v31, 0.0 }
 0x81a   : > { %v3277_v34 = vpack.c.bf16 %v3227_v30, %v3225_v29 }
 0x81b   : > { %v3278_v35 = vpack.c.bf16 %v3228_v33, %v3226_v32 }
 0x81d   : > { %v3112_v3 = vpop.f32.mrb[168].mxu1  ;;  %3371 = vmatprep.subr.bf16.mxu0 %v3278_v35 }
 0x81e   : > { %v3114_v37 = vpop.f32.mrb[169].mxu1  ;;  %3372 = vmatpush1.bf16.msra.mxu0 %v3277_v34  ;;  %v3229_v39 = vmax.f32 %v3112_v3, 0.0 }
 0x81f   : > { %v3116_v38 = vpop.f32.mrb[170].mxu1  ;;  %v3230_v43 = vmax.f32 %v3114_v37, 0.0 }
 0x820   : > { %v3231_v40 = vmax.f32 %v3116_v38, 0.0  ;;  %v3118_v41 = vpop.f32.mrb[171].mxu1 }
 0x821   : > { %v3232_v44 = vmax.f32 %v3118_v41, 0.0 }
 0x822   : > { %v3279_v45 = vpack.c.bf16 %v3231_v40, %v3229_v39 }
 0x823   : > { %v3280_v46 = vpack.c.bf16 %v3232_v44, %v3230_v43 }
 0x825   : > { %v3122_v47 = vpop.f32.mrb[172].mxu1  ;;  %3373 = vmatprep.subr.bf16.mxu0 %v3280_v46 }
 0x826   : > { %v3124_v48 = vpop.f32.mrb[173].mxu1  ;;  %3374 = vmatpush1.bf16.msra.mxu0 %v3279_v45  ;;  %v3233_v50 = vmax.f32 %v3122_v47, 0.0 }
 0x827   : > { %v3126_v49 = vpop.f32.mrb[174].mxu1  ;;  %v3234_v53 = vmax.f32 %v3124_v48, 0.0 }
 0x828   : > { %v3235_v51 = vmax.f32 %v3126_v49, 0.0  ;;  %v3128_v52 = vpop.f32.mrb[175].mxu1 }
 0x829   : > { %v3236_v54 = vmax.f32 %v3128_v52, 0.0 }
 0x82a   : > { %v3281_v55 = vpack.c.bf16 %v3235_v51, %v3233_v50 }
 0x82b   : > { %v3282_v56 = vpack.c.bf16 %v3236_v54, %v3234_v53 }
 0x82d   : > { %v3132_v57 = vpop.f32.mrb[176].mxu1  ;;  %3375 = vmatprep.subr.bf16.mxu0 %v3282_v56 }
 0x82e   : > { %v3134_v58 = vpop.f32.mrb[177].mxu1  ;;  %3376 = vmatpush1.bf16.msra.mxu0 %v3281_v55  ;;  %v3237_v60 = vmax.f32 %v3132_v57, 0.0 }
 0x82f   : > { %v3136_v59 = vpop.f32.mrb[178].mxu1  ;;  %v3238_v63 = vmax.f32 %v3134_v58, 0.0 }
 0x830   : > { %v3239_v61 = vmax.f32 %v3136_v59, 0.0  ;;  %v3138_v62 = vpop.f32.mrb[179].mxu1 }
 0x831   : > { %v3240_v7 = vmax.f32 %v3138_v62, 0.0 }
 0x832   : > { %v3283_v8 = vpack.c.bf16 %v3239_v61, %v3237_v60 }
 0x833   : > { %v3284_v9 = vpack.c.bf16 %v3240_v7, %v3238_v63  ;;  %v4049_v63 = vld [vmem:[%s4854_s2 + $0x38] ss:$8 sps:$4 sm:$0xff]   ;;  %v4052_v7 = vld [vmem:[%s4854_s2 + $0x4c] ss:$8 sps:$4 sm:$0xff]  }
 0x835   : > { %v3142_v18 = vpop.f32.mrb[180].mxu1  ;;  %3377 = vmatprep.subr.bf16.mxu0 %v3284_v9  ;;  %v4054_v9 = vld [vmem:[%s4854_s2 + $0x48] ss:$8 sps:$4 sm:$0xff]  }
 0x836   : > { %v3144_v1 = vpop.f32.mrb[181].mxu1  ;;  %3378 = vmatpush1.bf16.msra.mxu0 %v3283_v8  ;;  %v3241_v36 = vmax.f32 %v3142_v18, 0.0  ;;  %v3301_v8 = vld [vmem:[%s4854_s2 + $0x58] sm:$0xff] }
 0x837   : > { %v3146_v2 = vpop.f32.mrb[182].mxu1  ;;  %v3242_v15 = vmax.f32 %v3144_v1, 0.0  ;;  %v3899_v18 = vcombine.high %v3301_v8, %v3301_v8  ;;  %v3898_v1 = vcombine.low %v3301_v8, %v3301_v8 }
 0x838   : > { %v3243_v5 = vmax.f32 %v3146_v2, 0.0  ;;  %v3148_v42 = vpop.f32.mrb[183].mxu1  ;;  %v3310_v2 = vpop.permute.xlu1 %3309 }
 0x839   : > { %v3244_v10 = vmax.f32 %v3148_v42, 0.0 }
 0x83a   : > { %v3285_v11 = vpack.c.bf16 %v3243_v5, %v3241_v36 }
 0x83b   : > { %v3286_v12 = vpack.c.bf16 %v3244_v10, %v3242_v15  ;;  %v3315_v15 = vpop.permute.xlu0 %3314 }
 0x83d   : > { %v3152_v13 = vpop.f32.mrb[184].mxu1  ;;  %3379 = vmatprep.subr.bf16.mxu0 %v3286_v12 }
 0x83e   : > { %v3154_v14 = vpop.f32.mrb[185].mxu1  ;;  %3380 = vmatpush1.bf16.msra.mxu0 %v3285_v11  ;;  %v3245_v17 = vmax.f32 %v3152_v13, 0.0 }
 0x83f   : > { %v3156_v16 = vpop.f32.mrb[186].mxu1  ;;  %v3246_v24 = vmax.f32 %v3154_v14, 0.0 }
 0x840   : > { %v3247_v4 = vmax.f32 %v3156_v16, 0.0  ;;  %v3158_v6 = vpop.f32.mrb[187].mxu1  ;;  %v3320_v16 = vpop.permute.xlu1 %3319 }
 0x841   : > { %v3248_v19 = vmax.f32 %v3158_v6, 0.0 }
 0x842   : > { %v3287_v20 = vpack.c.bf16 %v3247_v4, %v3245_v17 }
 0x843   : > { %v3288_v21 = vpack.c.bf16 %v3248_v19, %v3246_v24  ;;  %v3325_v24 = vpop.permute.xlu0 %3324 }
 0x845   : > { %v3162_v22 = vpop.f32.mrb[188].mxu1  ;;  %3381 = vmatprep.subr.bf16.mxu0 %v3288_v21 }
 0x846   : > { %v3164_v23 = vpop.f32.mrb[189].mxu1  ;;  %3382 = vmatpush1.bf16.msra.mxu0 %v3287_v20  ;;  %v3249_v26 = vmax.f32 %v3162_v22, 0.0 }
 0x847   : > { %v3166_v25 = vpop.f32.mrb[190].mxu1  ;;  %v3250_v28 = vmax.f32 %v3164_v23, 0.0 }
 0x848   : > { %v3251_v0 = vmax.f32 %v3166_v25, 0.0  ;;  %v3168_v27 = vpop.f32.mrb[191].mxu1  ;;  %v3330_v25 = vpop.permute.xlu1 %3329 }
 0x849   : > { %v3252_v29 = vmax.f32 %v3168_v27, 0.0 }
 0x84a   : > { %v3289_v30 = vpack.c.bf16 %v3251_v0, %v3249_v26 }
 0x84b   : > { %v3290_v31 = vpack.c.bf16 %v3252_v29, %v3250_v28 }
 0x84d   : > { %v3172_v32 = vpop.f32.mrb[192].mxu1  ;;  %3383 = vmatprep.subr.bf16.mxu0 %v3290_v31 }
 0x84e   : > { %v3174_v33 = vpop.f32.mrb[193].mxu1  ;;  %3384 = vmatpush1.bf16.msra.mxu0 %v3289_v30  ;;  %v3253_v35 = vmax.f32 %v3172_v32, 0.0 }
 0x84f   : > { %v3176_v34 = vpop.f32.mrb[194].mxu1  ;;  %v3254_v38 = vmax.f32 %v3174_v33, 0.0 }
 0x850   : > { %v3255_v3 = vmax.f32 %v3176_v34, 0.0  ;;  %v3178_v37 = vpop.f32.mrb[195].mxu1 }
 0x851   : > { %v3256_v39 = vmax.f32 %v3178_v37, 0.0 }
 0x852   : > { %v3291_v40 = vpack.c.bf16 %v3255_v3, %v3253_v35 }
 0x853   : > { %v3292_v41 = vpack.c.bf16 %v3256_v39, %v3254_v38 }
 0x855   : > { %v3182_v43 = vpop.f32.mrb[196].mxu1  ;;  %3385 = vmatprep.subr.bf16.mxu0 %v3292_v41 }
 0x856   : > { %v3184_v44 = vpop.f32.mrb[197].mxu1  ;;  %3386 = vmatpush1.bf16.msra.mxu0 %v3291_v40  ;;  %v3257_v46 = vmax.f32 %v3182_v43, 0.0 }
 0x857   : > { %v3186_v45 = vpop.f32.mrb[198].mxu1  ;;  %v3258_v49 = vmax.f32 %v3184_v44, 0.0 }
 0x858   : > { %v3259_v47 = vmax.f32 %v3186_v45, 0.0  ;;  %v3188_v48 = vpop.f32.mrb[199].mxu1 }
 0x859   : > { %v3260_v50 = vmax.f32 %v3188_v48, 0.0 }
 0x85a   : > { %v3293_v51 = vpack.c.bf16 %v3259_v47, %v3257_v46 }
 0x85b   : > { %v3294_v52 = vpack.c.bf16 %v3260_v50, %v3258_v49 }
 0x85d   : > { %v3192_v53 = vpop.f32.mrb[200].mxu1  ;;  %3387 = vmatprep.subr.bf16.mxu0 %v3294_v52 }
 0x85e   : > { %v3194_v54 = vpop.f32.mrb[201].mxu1  ;;  %3388 = vmatpush1.bf16.msra.mxu0 %v3293_v51  ;;  %v3261_v56 = vmax.f32 %v3192_v53, 0.0 }
 0x85f   : > { %v3196_v55 = vpop.f32.mrb[202].mxu1  ;;  %v3262_v59 = vmax.f32 %v3194_v54, 0.0 }
 0x860   : > { %v3263_v57 = vmax.f32 %v3196_v55, 0.0  ;;  %v3198_v58 = vpop.f32.mrb[203].mxu1 }
 0x861   : > { %v3264_v60 = vmax.f32 %v3198_v58, 0.0 }
 0x862   : > { %v3295_v61 = vpack.c.bf16 %v3263_v57, %v3261_v56 }
 0x863   : > { %v3296_v62 = vpack.c.bf16 %v3264_v60, %v3262_v59 }
 0x865   : > { %3389 = vmatprep.subr.bf16.mxu0 %v3296_v62 }
 0x866   : > { %3390 = vmatpush1.bf16.msra.mxu0 %v3295_v61 }
 0x869   : > { %3392 = vmatmul.mubr.bf16.vlgmr.msra.gmra.mrb[204].mxu0 %v4049_v63 }
 0x86a   : > { %3401 = vmatprep.mubr.bf16.mxu0 %v4052_v7 }
 0x871   : > { %3402 = vmatmul.mubr.bf16.gmra.mrb[208].mxu0 %v4054_v9 }
 0x872   : > { %3411 = vmatprep.mubr.bf16.mxu0 %v3899_v18 }
 0x879   : > { %3412 = vmatmul.mubr.bf16.gmra.mrb[212].mxu0 %v3898_v1 }
 0x93c   : > { %v3393_v36 = vpop.f32.mrb[204].mxu0 }
 0x93d   : > { %v3394_v5 = vadd.f32 %v3393_v36, %v3310_v2  ;;  %v3395_v42 = vpop.f32.mrb[205].mxu0 }
 0x93e   : > { %v3396_v10 = vadd.f32 %v3395_v42, %v3310_v2  ;;  %v3397_v11 = vpop.f32.mrb[206].mxu0 }
 0x93f   : > { %3420 = vst [vmem:[%s4353_s5 + $0x70] sm:$0xff] %v3394_v5  ;;  %v3398_v12 = vadd.f32 %v3397_v11, %v3315_v15  ;;  %v3399_v13 = vpop.f32.mrb[207].mxu0 }
 0x940   : > { %3421 = vst [vmem:[%s4353_s5 + $0x78] sm:$0xff] %v3396_v10  ;;  %v3400_v14 = vadd.f32 %v3399_v13, %v3315_v15 }
 0x941   : > { %3422 = vst [vmem:[%s4353_s5 + $0x80] sm:$0xff] %v3398_v12 }
 0x942   : > { %3423 = vst [vmem:[%s4353_s5 + $0x88] sm:$0xff] %v3400_v14 }
 0x944   : > { %v3403_v17 = vpop.f32.mrb[208].mxu0 }
 0x945   : > { %v3404_v4 = vadd.f32 %v3403_v17, %v3320_v16  ;;  %v3405_v6 = vpop.f32.mrb[209].mxu0 }
 0x946   : > { %v3406_v19 = vadd.f32 %v3405_v6, %v3320_v16  ;;  %v3407_v20 = vpop.f32.mrb[210].mxu0 }
 0x947   : > { %3424 = vst [vmem:[%s4353_s5 + $0x90] sm:$0xff] %v3404_v4  ;;  %v3408_v21 = vadd.f32 %v3407_v20, %v3325_v24  ;;  %v3409_v22 = vpop.f32.mrb[211].mxu0 }
 0x948   : > { %3425 = vst [vmem:[%s4353_s5 + $0x98] sm:$0xff] %v3406_v19  ;;  %v3410_v23 = vadd.f32 %v3409_v22, %v3325_v24 }
 0x949   : > { %3426 = vst [vmem:[%s4353_s5 + $0xa0] sm:$0xff] %v3408_v21 }
 0x94a   : > { %3427 = vst [vmem:[%s4353_s5 + $0xa8] sm:$0xff] %v3410_v23 }
 0x94c   : > { %v3413_v26 = vpop.f32.mrb[212].mxu0 }
 0x94d   : > { %v3414_v0 = vadd.f32 %v3413_v26, %v3330_v25  ;;  %v3415_v27 = vpop.f32.mrb[213].mxu0 }
 0x94e   : > { %v3416_v28 = vadd.f32 %v3415_v27, %v3330_v25  ;;  %v3417_v29 = vpop.f32.mrb[214].mxu0 }
 0x94f   : > { %3428 = vst [vmem:[%s4353_s5 + $0xb0] sm:$0xff] %v3414_v0  ;;  %v3418_v30 = vpop.f32.mrb[215].mxu0 }
 0x950   : > { %3429 = vst [vmem:[%s4353_s5 + $0xb8] sm:$0xff] %v3416_v28 }
 0x951 PF: > { %s14_s17 = sadd.s32 1, %s4091_s17   ;;  %s4857_s15 = smov %s4087_s16 }
 0x952   : > { %p11_p5 = scmp.ge.s32.totalorder %s14_s17, 4   ;;  %s4858_s16 = smov %s4860_s18 }
 0x954   :  { %13 = sbr.rel (!%p11_p5) target bundleno = 2 (0x2), region = 71 }

</bundles_post_ra>
